<compile_context>
chip_gen: v6e
topology: v6e:2x2x1
jax: 0.10.0
libtpu: 0.0.40
codegen_flags: <defaults>
</compile_context>

<pallas_src>
import math
import jax
import jax.numpy as jnp
from jax.experimental import pallas as pl
from jax.experimental.pallas import tpu as pltpu

NUM_FREQ = 64           # FourierEmbedding(2, dim, 64)
NUM_TYPES = 4           # nn.Embedding(4, dim)
LN_EPS = 1e-5
TWO_PI = 2.0 * math.pi
KF = 2 * NUM_FREQ       # per-input-dim feature width: [cos | sin] = 128


# ----------------------------------------------------------------------------
# Pallas kernel: one tile of TM rows -> (TM, dim) object embeddings
# ----------------------------------------------------------------------------
def _static_obj_kernel(
    slab_ref,   # (TM, 4)      f32   [width, length, category, valid]
    four_ref,   # (4, 128)     f32   rows: 2pi*f0 dup, 2pi*f1 dup, phase offset, 0
    w1_ref,     # (2, 128, D)  bf16  per-dim first-layer weights [cos; sin]
    v1_ref,     # (8, D)       f32   [w1x0, b10, g10, beta10, w1x1, b11, g11, beta11]
    w2_ref,     # (2, D, D)    bf16  per-dim second-layer weights
    v2_ref,     # (4, D)       f32   [b2_sum, ln_out_gamma, ln_out_beta, b_out]
    wout_ref,   # (D, D)       bf16  to_out Linear weight
    temb_ref,   # (4, D)       f32   type embedding table
    out_ref,    # (TM, D)
):
    x0 = slab_ref[:, 0:1]            # (TM, 1)
    x1 = slab_ref[:, 1:2]            # (TM, 1)
    catv = slab_ref[:, 2:3]          # (TM, 1)  category as float (0..3, exact)
    valid = slab_ref[:, 3:4] != 0.0  # (TM, 1)

    # ---- Fourier features per input dim: [cos(2*pi*f*x) | sin(...)] in one
    #      128-lane cos each (sin(t) == cos(t - pi/2)).  EUP work, f32.
    off = four_ref[2:3, :]                                        # (1, 128)
    feats0 = jnp.cos(x0 * four_ref[0:1, :] - off).astype(jnp.bfloat16)  # (TM,128)
    feats1 = jnp.cos(x1 * four_ref[1:2, :] - off).astype(jnp.bfloat16)  # (TM,128)

    # ---- first Linear of each per-dim MLP: two dense K=128 matmuls
    h0 = jnp.dot(feats0, w1_ref[0], preferred_element_type=jnp.float32)  # (TM,D)
    h1 = jnp.dot(feats1, w1_ref[1], preferred_element_type=jnp.float32)  # (TM,D)
    h0 = h0 + x0 * v1_ref[0:1, :] + v1_ref[1:2, :]
    h1 = h1 + x1 * v1_ref[4:5, :] + v1_ref[5:6, :]

    # ---- plain LayerNorm + ReLU per half (standard D-lane reductions, no masks)
    def ln_relu(h, gamma, beta):
        mu = jnp.mean(h, axis=-1, keepdims=True)
        d = h - mu
        var = jnp.mean(d * d, axis=-1, keepdims=True)
        return jnp.maximum(d * jax.lax.rsqrt(var + LN_EPS) * gamma + beta, 0.0)

    h0 = ln_relu(h0, v1_ref[2:3, :], v1_ref[3:4, :])
    h1 = ln_relu(h1, v1_ref[6:7, :], v1_ref[7:8, :])

    # ---- second Linear of each MLP, summed (b2_0 + b2_1 folded into v2 row 0)
    acc = (jnp.dot(h0.astype(jnp.bfloat16), w2_ref[0],
                   preferred_element_type=jnp.float32)
           + jnp.dot(h1.astype(jnp.bfloat16), w2_ref[1],
                     preferred_element_type=jnp.float32)
           + v2_ref[0:1, :])                                       # (TM, D)

    # ---- to_out: LayerNorm -> ReLU -> Linear
    a = ln_relu(acc, v2_ref[1:2, :], v2_ref[2:3, :])
    fe = jnp.dot(a.astype(jnp.bfloat16), wout_ref[...],
                 preferred_element_type=jnp.float32) + v2_ref[3:4, :]   # (TM, D)

    # ---- type embedding via VPU selects (no one-hot matmul); temb add folded
    #      into the final valid-mask select.
    temb = jnp.where(catv == 0.0, temb_ref[0:1, :], temb_ref[1:2, :])
    temb = jnp.where(catv == 2.0, temb_ref[2:3, :], temb)
    temb = jnp.where(catv == 3.0, temb_ref[3:4, :], temb)

    out_ref[...] = jnp.where(valid, fe + temb, 0.0).astype(out_ref.dtype)


# ----------------------------------------------------------------------------
# Parameter preprocessing (fold 2*pi, stack per-dim weights, pack small vectors)
# ----------------------------------------------------------------------------
def _prepare_kernel_params(p):
    f = (p["freqs"] * TWO_PI).astype(jnp.float32)                   # (2, 64)
    half_pi = jnp.full((NUM_FREQ,), 0.5 * math.pi, jnp.float32)
    zeros64 = jnp.zeros((NUM_FREQ,), jnp.float32)
    four = jnp.stack([
        jnp.concatenate([f[0], f[0]]),          # 2*pi*f0 dup over cos|sin lanes
        jnp.concatenate([f[1], f[1]]),          # 2*pi*f1 dup
        jnp.concatenate([zeros64, half_pi]),    # phase offset (sin lanes)
        jnp.zeros((KF,), jnp.float32),
    ], axis=0)                                                      # (4, 128)

    w1 = jnp.stack([
        jnp.concatenate([p["w1c"][0], p["w1s"][0]], axis=0),
        jnp.concatenate([p["w1c"][1], p["w1s"][1]], axis=0),
    ], axis=0).astype(jnp.bfloat16)                                 # (2, 128, D)

    v1 = jnp.concatenate([
        p["w1x"][0], p["b1"][0], p["ln1g"][0], p["ln1b"][0],
        p["w1x"][1], p["b1"][1], p["ln1g"][1], p["ln1b"][1],
    ], axis=0).astype(jnp.float32)                                  # (8, D)

    w2 = jnp.stack([p["w2"][0], p["w2"][1]], axis=0).astype(jnp.bfloat16)  # (2,D,D)

    v2 = jnp.concatenate([
        p["b2"][0] + p["b2"][1], p["lnog"], p["lnob"], p["bout"],
    ], axis=0).astype(jnp.float32)                                  # (4, D)

    wout = p["wout"].astype(jnp.bfloat16)                           # (D, D)
    temb = p["temb"].astype(jnp.float32)                            # (4, D)
    return four, w1, v1, w2, v2, wout, temb


# ----------------------------------------------------------------------------
# Row tiling: sublane-aligned, prefer even grid length >= 2 (v7x megacore)
# ----------------------------------------------------------------------------
def _choose_row_tiling(M, tm_req):
    cdiv = lambda a, b: -(-a // b)
    tm = max(8, min((max(tm_req, 8) // 8) * 8, ((M + 7) // 8) * 8))
    n = cdiv(M, tm)
    if M > 16 and (n < 2 or n % 2):
        n = max(2, n + (n % 2))
        tm = max(8, ((cdiv(M, n) + 7) // 8) * 8)
    m_pad = tm * cdiv(M, tm)
    return tm, m_pad


# ----------------------------------------------------------------------------
# Wrapper
# ----------------------------------------------------------------------------
def static_objects_encoder(params, pos, heading, shape, category, valid_mask,
                           *, tm=512, out_dtype=jnp.float32):
    """JAX/Pallas equivalent of StaticObjectsEncoder.forward.

    pos:        (bs, N, 2) f32
    heading:    (bs, N)    f32
    shape:      (bs, N, 2) f32
    category:   (bs, N)    i32
    valid_mask: (bs, N)    bool
    returns (obj_emb (bs,N,dim), obj_pos (bs,N,3), ~valid_mask (bs,N))
    """
    bs, N = valid_mask.shape
    dim = params["wout"].shape[-1]

    if N == 0:
        # Matches the torch N == 0 branch: no masking, no heading wrap.
        obj_emb = jnp.zeros((bs, 0, dim), out_dtype)
        obj_pos = jnp.concatenate([pos, heading[..., None]], axis=-1)
        return obj_emb, obj_pos, ~valid_mask

    M = bs * N
    tm, m_pad = _choose_row_tiling(M, tm)

    # Categories outside [0, NUM_TYPES) would silently hit embedding row 1 in
    # the select chain; clamp (torch.nn.Embedding would have raised anyway).
    cat = jnp.clip(category, 0, NUM_TYPES - 1)

    # Packed input slab: one row DMA per grid step.
    slab = jnp.concatenate([
        shape.reshape(M, 2).astype(jnp.float32),
        cat.reshape(M, 1).astype(jnp.float32),
        valid_mask.reshape(M, 1).astype(jnp.float32),
    ], axis=-1)                                                     # (M, 4)
    if m_pad != M:
        slab = jnp.pad(slab, ((0, m_pad - M), (0, 0)))

    four, w1, v1, w2, v2, wout, temb = _prepare_kernel_params(params)

    def full(a):
        zeros = (0,) * a.ndim
        return pl.BlockSpec(a.shape, lambda i, z=zeros: z)

    out_itemsize = jnp.dtype(out_dtype).itemsize
    nbytes = lambda a: a.size * a.dtype.itemsize
    w_bytes = sum(nbytes(a) for a in (four, w1, v1, w2, v2, wout, temb))
    tile_in = tm * 4 * 4
    tile_out = tm * dim * out_itemsize
    # Explicit VMEM budget: double-buffered tiles + resident weights +
    # intermediates headroom; clamped to [32 MiB default, 64 MiB v7x physical].
    vmem_limit = int(min(64 << 20,
                         max(32 << 20,
                             2 * (w_bytes + tile_in + tile_out)
                             + 12 * tm * dim * 4 + (2 << 20))))

    cost = pl.CostEstimate(
        flops=int(m_pad * (2 * 2 * KF * dim + 3 * 2 * dim * dim)),
        transcendentals=int(m_pad * 2 * KF),
        bytes_accessed=int(w_bytes + m_pad * 4 * 4 + m_pad * dim * out_itemsize),
    )

    out = pl.pallas_call(
        _static_obj_kernel,
        out_shape=jax.ShapeDtypeStruct((m_pad, dim), out_dtype),
        grid_spec=pltpu.PrefetchScalarGridSpec(
            num_scalar_prefetch=0,
            grid=(m_pad // tm,),
            in_specs=[
                pl.BlockSpec((tm, 4), lambda i: (i, 0)),   # packed slab
                full(four), full(w1), full(v1),
                full(w2), full(v2), full(wout), full(temb),
            ],
            out_specs=pl.BlockSpec((tm, dim), lambda i: (i, 0)),
        ),
        compiler_params=pltpu.CompilerParams(
            dimension_semantics=("parallel",),
            vmem_limit_bytes=vmem_limit),
        cost_estimate=cost,
    )(slab, four, w1, v1, w2, v2, wout, temb)

    obj_emb = out[:M].reshape(bs, N, dim)

    # Elementwise glue (matches torch: heading wrap + concat, invert mask).
    heading_w = jnp.mod(heading + math.pi, TWO_PI) - math.pi
    obj_pos = jnp.concatenate([pos, heading_w[..., None]], axis=-1)
    return obj_emb, obj_pos, ~valid_mask


# ----------------------------------------------------------------------------
# Deterministic synthetic parameters (shapes per the module __init__)
# ----------------------------------------------------------------------------
def init_params(key, dim):
    ks = jax.random.split(key, 10)
    nrm = lambda k, shp, std: std * jax.random.normal(k, shp, jnp.float32)
    return dict(
        freqs=jax.random.normal(ks[0], (2, NUM_FREQ), jnp.float32),
        w1c=nrm(ks[1], (2, NUM_FREQ, dim), 0.02),
        w1s=nrm(ks[2], (2, NUM_FREQ, dim), 0.02),
        w1x=nrm(ks[3], (2, 1, dim), 0.02),
        b1=nrm(ks[4], (2, 1, dim), 0.02),
        ln1g=jnp.ones((2, 1, dim), jnp.float32),
        ln1b=jnp.zeros((2, 1, dim), jnp.float32),
        w2=nrm(ks[5], (2, dim, dim), 0.02),
        b2=nrm(ks[6], (2, 1, dim), 0.02),
        lnog=jnp.ones((1, dim), jnp.float32),
        lnob=jnp.zeros((1, dim), jnp.float32),
        wout=nrm(ks[7], (dim, dim), 0.02),
        bout=nrm(ks[8], (1, dim), 0.02),
        temb=0.01 * jax.random.normal(ks[9], (NUM_TYPES, dim), jnp.float32),
    )


# ----------------------------------------------------------------------------
# Pure-JAX f32 reference (mirrors the torch forward) for a correctness check
# ----------------------------------------------------------------------------
def reference_forward(params, pos, heading, shape, category, valid_mask):
    accs = []
    for i in range(2):
        xi = shape[..., i:i + 1]
        phase = xi * params["freqs"][i] * TWO_PI
        h = (jnp.cos(phase) @ params["w1c"][i]
             + jnp.sin(phase) @ params["w1s"][i]
             + xi * params["w1x"][i] + params["b1"][i])
        mu = h.mean(-1, keepdims=True)
        var = ((h - mu) ** 2).mean(-1, keepdims=True)
        h = (h - mu) / jnp.sqrt(var + LN_EPS) * params["ln1g"][i] + params["ln1b"][i]
        h = jnp.maximum(h, 0.0)
        accs.append(h @ params["w2"][i] + params["b2"][i])
    a = accs[0] + accs[1]
    mu = a.mean(-1, keepdims=True)
    var = ((a - mu) ** 2).mean(-1, keepdims=True)
    a = (a - mu) / jnp.sqrt(var + LN_EPS) * params["lnog"] + params["lnob"]
    a = jnp.maximum(a, 0.0)
    fe = a @ params["wout"] + params["bout"]
    emb = fe + params["temb"][category]
    emb = jnp.where(valid_mask[..., None], emb, 0.0)
    heading_w = jnp.mod(heading + math.pi, TWO_PI) - math.pi
    obj_pos = jnp.concatenate([pos, heading_w[..., None]], axis=-1)
    return emb, obj_pos, ~valid_mask


if __name__ == "__main__":
    dim, bs, N = 128, 2, 8
    key = jax.random.PRNGKey(0)
    kp, k0, k1, k2, k3, k4 = jax.random.split(key, 6)

    params = init_params(kp, dim)
    pos = jax.random.normal(k0, (bs, N, 2), jnp.float32) * 10.0
    heading = jax.random.uniform(k1, (bs, N), jnp.float32,
                                 minval=-2.0 * math.pi, maxval=2.0 * math.pi)
    shape = jax.random.uniform(k2, (bs, N, 2), jnp.float32, minval=0.5, maxval=5.0)
    category = jax.random.randint(k3, (bs, N), 0, NUM_TYPES, jnp.int32)
    valid_mask = jax.random.uniform(k4, (bs, N)) > 0.3

    obj_emb, obj_pos, invalid = static_objects_encoder(
        params, pos, heading, shape, category, valid_mask)
    jax.block_until_ready((obj_emb, obj_pos, invalid))

    ref_emb, ref_pos, ref_inv = reference_forward(
        params, pos, heading, shape, category, valid_mask)

    assert obj_emb.shape == (bs, N, dim)
    assert obj_pos.shape == (bs, N, 3)
    assert invalid.shape == (bs, N)
    max_err = float(jnp.max(jnp.abs(obj_emb - ref_emb)))
    assert jnp.allclose(obj_emb, ref_emb, atol=2e-2, rtol=2e-2), max_err
    assert jnp.allclose(obj_pos, ref_pos, atol=1e-5, rtol=1e-5)
    assert bool(jnp.all(invalid == ref_inv))

    print("KERNEL_OK")
</pallas_src>

<mosaic_0001>
module attributes {stable_mosaic.version = 11 : i64} {
  func.func @_static_obj_kernel(%arg0: i32, %arg1: memref<16x4xf32, #tpu.memory_space<vmem>>, %arg2: memref<4x128xf32, #tpu.memory_space<vmem>>, %arg3: memref<2x128x128xbf16, #tpu.memory_space<vmem>>, %arg4: memref<8x128xf32, #tpu.memory_space<vmem>>, %arg5: memref<2x128x128xbf16, #tpu.memory_space<vmem>>, %arg6: memref<4x128xf32, #tpu.memory_space<vmem>>, %arg7: memref<128x128xbf16, #tpu.memory_space<vmem>>, %arg8: memref<4x128xf32, #tpu.memory_space<vmem>>, %arg9: memref<16x128xf32, #tpu.memory_space<vmem>>) attributes {dimension_semantics = [#tpu.dimension_semantics<parallel>], iteration_bounds = array<i64: 1>, scalar_prefetch = 0 : i64, scratch_operands = 0 : i64, tpu.core_type = #tpu.core_type<tc>, window_params = [{transform_indices = @transform_0, window_bounds = array<i64: 16, 4>}, {pipeline_mode = #tpu.pipeline_mode<synchronous>, transform_indices = @transform_1, window_bounds = array<i64: 4, 128>}, {pipeline_mode = #tpu.pipeline_mode<synchronous>, transform_indices = @transform_2, window_bounds = array<i64: 2, 128, 128>}, {pipeline_mode = #tpu.pipeline_mode<synchronous>, transform_indices = @transform_3, window_bounds = array<i64: 8, 128>}, {pipeline_mode = #tpu.pipeline_mode<synchronous>, transform_indices = @transform_4, window_bounds = array<i64: 2, 128, 128>}, {pipeline_mode = #tpu.pipeline_mode<synchronous>, transform_indices = @transform_5, window_bounds = array<i64: 4, 128>}, {pipeline_mode = #tpu.pipeline_mode<synchronous>, transform_indices = @transform_6, window_bounds = array<i64: 128, 128>}, {pipeline_mode = #tpu.pipeline_mode<synchronous>, transform_indices = @transform_7, window_bounds = array<i64: 4, 128>}, {transform_indices = @transform_8, window_bounds = array<i64: 16, 128>}]} {
    %c0 = arith.constant 0 : index
    %c0_0 = arith.constant 0 : index
    %0 = vector.load %arg1[%c0, %c0_0] : memref<16x4xf32, #tpu.memory_space<vmem>>, vector<16x1xf32>
    %c0_1 = arith.constant 0 : index
    %c1 = arith.constant 1 : index
    %1 = vector.load %arg1[%c0_1, %c1] : memref<16x4xf32, #tpu.memory_space<vmem>>, vector<16x1xf32>
    %c0_2 = arith.constant 0 : index
    %c2 = arith.constant 2 : index
    %2 = vector.load %arg1[%c0_2, %c2] : memref<16x4xf32, #tpu.memory_space<vmem>>, vector<16x1xf32>
    %c0_3 = arith.constant 0 : index
    %c3 = arith.constant 3 : index
    %3 = vector.load %arg1[%c0_3, %c3] : memref<16x4xf32, #tpu.memory_space<vmem>>, vector<16x1xf32>
    %cst = arith.constant 0.000000e+00 : f32
    %4 = vector.broadcast %cst : f32 to vector<16x1xf32>
    %5 = arith.cmpf one, %3, %4 : vector<16x1xf32>
    %c2_4 = arith.constant 2 : index
    %c0_5 = arith.constant 0 : index
    %6 = vector.load %arg2[%c2_4, %c0_5] : memref<4x128xf32, #tpu.memory_space<vmem>>, vector<1x128xf32>
    %c0_6 = arith.constant 0 : index
    %c0_7 = arith.constant 0 : index
    %7 = vector.load %arg2[%c0_6, %c0_7] : memref<4x128xf32, #tpu.memory_space<vmem>>, vector<1x128xf32>
    %8 = vector.broadcast %0 : vector<16x1xf32> to vector<16x128xf32>
    %9 = vector.broadcast %7 : vector<1x128xf32> to vector<16x128xf32>
    %10 = arith.mulf %8, %9 : vector<16x128xf32>
    %11 = vector.broadcast %6 : vector<1x128xf32> to vector<16x128xf32>
    %12 = arith.subf %10, %11 : vector<16x128xf32>
    %13 = math.cos %12 : vector<16x128xf32>
    %14 = arith.truncf %13 : vector<16x128xf32> to vector<16x128xbf16>
    %c1_8 = arith.constant 1 : index
    %c0_9 = arith.constant 0 : index
    %15 = vector.load %arg2[%c1_8, %c0_9] : memref<4x128xf32, #tpu.memory_space<vmem>>, vector<1x128xf32>
    %16 = vector.broadcast %1 : vector<16x1xf32> to vector<16x128xf32>
    %17 = vector.broadcast %15 : vector<1x128xf32> to vector<16x128xf32>
    %18 = arith.mulf %16, %17 : vector<16x128xf32>
    %19 = vector.broadcast %6 : vector<1x128xf32> to vector<16x128xf32>
    %20 = arith.subf %18, %19 : vector<16x128xf32>
    %21 = math.cos %20 : vector<16x128xf32>
    %22 = arith.truncf %21 : vector<16x128xf32> to vector<16x128xbf16>
    %c0_10 = arith.constant 0 : index
    %c0_11 = arith.constant 0 : index
    %c0_12 = arith.constant 0 : index
    %23 = vector.load %arg3[%c0_10, %c0_11, %c0_12] : memref<2x128x128xbf16, #tpu.memory_space<vmem>>, vector<1x128x128xbf16>
    %24 = vector.shape_cast %23 : vector<1x128x128xbf16> to vector<128x128xbf16>
    %cst_13 = arith.constant dense<0.000000e+00> : vector<16x128xf32>
    %25 = tpu.matmul %14, %24, %cst_13 {dimension_numbers = #tpu.dot_dimension_numbers<[1], [0], [0], [1], [0, 0, 1, 1], [], []>} : vector<16x128xbf16>, vector<128x128xbf16>, vector<16x128xf32> -> vector<16x128xf32>
    %c1_14 = arith.constant 1 : index
    %c0_15 = arith.constant 0 : index
    %c0_16 = arith.constant 0 : index
    %26 = vector.load %arg3[%c1_14, %c0_15, %c0_16] : memref<2x128x128xbf16, #tpu.memory_space<vmem>>, vector<1x128x128xbf16>
    %27 = vector.shape_cast %26 : vector<1x128x128xbf16> to vector<128x128xbf16>
    %cst_17 = arith.constant dense<0.000000e+00> : vector<16x128xf32>
    %28 = tpu.matmul %22, %27, %cst_17 {dimension_numbers = #tpu.dot_dimension_numbers<[1], [0], [0], [1], [0, 0, 1, 1], [], []>} : vector<16x128xbf16>, vector<128x128xbf16>, vector<16x128xf32> -> vector<16x128xf32>
    %c0_18 = arith.constant 0 : index
    %c0_19 = arith.constant 0 : index
    %29 = vector.load %arg4[%c0_18, %c0_19] : memref<8x128xf32, #tpu.memory_space<vmem>>, vector<1x128xf32>
    %30 = vector.broadcast %0 : vector<16x1xf32> to vector<16x128xf32>
    %31 = vector.broadcast %29 : vector<1x128xf32> to vector<16x128xf32>
    %32 = arith.mulf %30, %31 : vector<16x128xf32>
    %33 = arith.addf %25, %32 : vector<16x128xf32>
    %c1_20 = arith.constant 1 : index
    %c0_21 = arith.constant 0 : index
    %34 = vector.load %arg4[%c1_20, %c0_21] : memref<8x128xf32, #tpu.memory_space<vmem>>, vector<1x128xf32>
    %35 = vector.broadcast %34 : vector<1x128xf32> to vector<16x128xf32>
    %36 = arith.addf %33, %35 : vector<16x128xf32>
    %c4 = arith.constant 4 : index
    %c0_22 = arith.constant 0 : index
    %37 = vector.load %arg4[%c4, %c0_22] : memref<8x128xf32, #tpu.memory_space<vmem>>, vector<1x128xf32>
    %38 = vector.broadcast %1 : vector<16x1xf32> to vector<16x128xf32>
    %39 = vector.broadcast %37 : vector<1x128xf32> to vector<16x128xf32>
    %40 = arith.mulf %38, %39 : vector<16x128xf32>
    %41 = arith.addf %28, %40 : vector<16x128xf32>
    %c5 = arith.constant 5 : index
    %c0_23 = arith.constant 0 : index
    %42 = vector.load %arg4[%c5, %c0_23] : memref<8x128xf32, #tpu.memory_space<vmem>>, vector<1x128xf32>
    %43 = vector.broadcast %42 : vector<1x128xf32> to vector<16x128xf32>
    %44 = arith.addf %41, %43 : vector<16x128xf32>
    %c2_24 = arith.constant 2 : index
    %c0_25 = arith.constant 0 : index
    %45 = vector.load %arg4[%c2_24, %c0_25] : memref<8x128xf32, #tpu.memory_space<vmem>>, vector<1x128xf32>
    %c3_26 = arith.constant 3 : index
    %c0_27 = arith.constant 0 : index
    %46 = vector.load %arg4[%c3_26, %c0_27] : memref<8x128xf32, #tpu.memory_space<vmem>>, vector<1x128xf32>
    %cst_28 = arith.constant dense<0.000000e+00> : vector<16xf32>
    %47 = vector.multi_reduction <add>, %36, %cst_28 [1] : vector<16x128xf32> to vector<16xf32>
    %48 = vector.shape_cast %47 : vector<16xf32> to vector<16x1xf32>
    %cst_29 = arith.constant 1.280000e+02 : f32
    %49 = vector.broadcast %cst_29 : f32 to vector<16x1xf32>
    %50 = arith.divf %48, %49 : vector<16x1xf32>
    %51 = vector.broadcast %50 : vector<16x1xf32> to vector<16x128xf32>
    %52 = arith.subf %36, %51 : vector<16x128xf32>
    %53 = arith.mulf %52, %52 : vector<16x128xf32>
    %cst_30 = arith.constant dense<0.000000e+00> : vector<16xf32>
    %54 = vector.multi_reduction <add>, %53, %cst_30 [1] : vector<16x128xf32> to vector<16xf32>
    %55 = vector.shape_cast %54 : vector<16xf32> to vector<16x1xf32>
    %cst_31 = arith.constant 1.280000e+02 : f32
    %56 = vector.broadcast %cst_31 : f32 to vector<16x1xf32>
    %57 = arith.divf %55, %56 : vector<16x1xf32>
    %cst_32 = arith.constant 9.99999974E-6 : f32
    %58 = vector.broadcast %cst_32 : f32 to vector<16x1xf32>
    %59 = arith.addf %57, %58 : vector<16x1xf32>
    %60 = math.rsqrt %59 : vector<16x1xf32>
    %61 = vector.broadcast %60 : vector<16x1xf32> to vector<16x128xf32>
    %62 = arith.mulf %52, %61 : vector<16x128xf32>
    %63 = vector.broadcast %45 : vector<1x128xf32> to vector<16x128xf32>
    %64 = arith.mulf %62, %63 : vector<16x128xf32>
    %65 = vector.broadcast %46 : vector<1x128xf32> to vector<16x128xf32>
    %66 = arith.addf %64, %65 : vector<16x128xf32>
    %cst_33 = arith.constant 0.000000e+00 : f32
    %67 = vector.broadcast %cst_33 : f32 to vector<16x128xf32>
    %68 = arith.maximumf %66, %67 : vector<16x128xf32>
    %c6 = arith.constant 6 : index
    %c0_34 = arith.constant 0 : index
    %69 = vector.load %arg4[%c6, %c0_34] : memref<8x128xf32, #tpu.memory_space<vmem>>, vector<1x128xf32>
    %c7 = arith.constant 7 : index
    %c0_35 = arith.constant 0 : index
    %70 = vector.load %arg4[%c7, %c0_35] : memref<8x128xf32, #tpu.memory_space<vmem>>, vector<1x128xf32>
    %cst_36 = arith.constant dense<0.000000e+00> : vector<16xf32>
    %71 = vector.multi_reduction <add>, %44, %cst_36 [1] : vector<16x128xf32> to vector<16xf32>
    %72 = vector.shape_cast %71 : vector<16xf32> to vector<16x1xf32>
    %cst_37 = arith.constant 1.280000e+02 : f32
    %73 = vector.broadcast %cst_37 : f32 to vector<16x1xf32>
    %74 = arith.divf %72, %73 : vector<16x1xf32>
    %75 = vector.broadcast %74 : vector<16x1xf32> to vector<16x128xf32>
    %76 = arith.subf %44, %75 : vector<16x128xf32>
    %77 = arith.mulf %76, %76 : vector<16x128xf32>
    %cst_38 = arith.constant dense<0.000000e+00> : vector<16xf32>
    %78 = vector.multi_reduction <add>, %77, %cst_38 [1] : vector<16x128xf32> to vector<16xf32>
    %79 = vector.shape_cast %78 : vector<16xf32> to vector<16x1xf32>
    %cst_39 = arith.constant 1.280000e+02 : f32
    %80 = vector.broadcast %cst_39 : f32 to vector<16x1xf32>
    %81 = arith.divf %79, %80 : vector<16x1xf32>
    %cst_40 = arith.constant 9.99999974E-6 : f32
    %82 = vector.broadcast %cst_40 : f32 to vector<16x1xf32>
    %83 = arith.addf %81, %82 : vector<16x1xf32>
    %84 = math.rsqrt %83 : vector<16x1xf32>
    %85 = vector.broadcast %84 : vector<16x1xf32> to vector<16x128xf32>
    %86 = arith.mulf %76, %85 : vector<16x128xf32>
    %87 = vector.broadcast %69 : vector<1x128xf32> to vector<16x128xf32>
    %88 = arith.mulf %86, %87 : vector<16x128xf32>
    %89 = vector.broadcast %70 : vector<1x128xf32> to vector<16x128xf32>
    %90 = arith.addf %88, %89 : vector<16x128xf32>
    %cst_41 = arith.constant 0.000000e+00 : f32
    %91 = vector.broadcast %cst_41 : f32 to vector<16x128xf32>
    %92 = arith.maximumf %90, %91 : vector<16x128xf32>
    %93 = arith.truncf %68 : vector<16x128xf32> to vector<16x128xbf16>
    %c0_42 = arith.constant 0 : index
    %c0_43 = arith.constant 0 : index
    %c0_44 = arith.constant 0 : index
    %94 = vector.load %arg5[%c0_42, %c0_43, %c0_44] : memref<2x128x128xbf16, #tpu.memory_space<vmem>>, vector<1x128x128xbf16>
    %95 = vector.shape_cast %94 : vector<1x128x128xbf16> to vector<128x128xbf16>
    %cst_45 = arith.constant dense<0.000000e+00> : vector<16x128xf32>
    %96 = tpu.matmul %93, %95, %cst_45 {dimension_numbers = #tpu.dot_dimension_numbers<[1], [0], [0], [1], [0, 0, 1, 1], [], []>} : vector<16x128xbf16>, vector<128x128xbf16>, vector<16x128xf32> -> vector<16x128xf32>
    %97 = arith.truncf %92 : vector<16x128xf32> to vector<16x128xbf16>
    %c1_46 = arith.constant 1 : index
    %c0_47 = arith.constant 0 : index
    %c0_48 = arith.constant 0 : index
    %98 = vector.load %arg5[%c1_46, %c0_47, %c0_48] : memref<2x128x128xbf16, #tpu.memory_space<vmem>>, vector<1x128x128xbf16>
    %99 = vector.shape_cast %98 : vector<1x128x128xbf16> to vector<128x128xbf16>
    %cst_49 = arith.constant dense<0.000000e+00> : vector<16x128xf32>
    %100 = tpu.matmul %97, %99, %cst_49 {dimension_numbers = #tpu.dot_dimension_numbers<[1], [0], [0], [1], [0, 0, 1, 1], [], []>} : vector<16x128xbf16>, vector<128x128xbf16>, vector<16x128xf32> -> vector<16x128xf32>
    %101 = arith.addf %96, %100 : vector<16x128xf32>
    %c0_50 = arith.constant 0 : index
    %c0_51 = arith.constant 0 : index
    %102 = vector.load %arg6[%c0_50, %c0_51] : memref<4x128xf32, #tpu.memory_space<vmem>>, vector<1x128xf32>
    %103 = vector.broadcast %102 : vector<1x128xf32> to vector<16x128xf32>
    %104 = arith.addf %101, %103 : vector<16x128xf32>
    %c1_52 = arith.constant 1 : index
    %c0_53 = arith.constant 0 : index
    %105 = vector.load %arg6[%c1_52, %c0_53] : memref<4x128xf32, #tpu.memory_space<vmem>>, vector<1x128xf32>
    %c2_54 = arith.constant 2 : index
    %c0_55 = arith.constant 0 : index
    %106 = vector.load %arg6[%c2_54, %c0_55] : memref<4x128xf32, #tpu.memory_space<vmem>>, vector<1x128xf32>
    %cst_56 = arith.constant dense<0.000000e+00> : vector<16xf32>
    %107 = vector.multi_reduction <add>, %104, %cst_56 [1] : vector<16x128xf32> to vector<16xf32>
    %108 = vector.shape_cast %107 : vector<16xf32> to vector<16x1xf32>
    %cst_57 = arith.constant 1.280000e+02 : f32
    %109 = vector.broadcast %cst_57 : f32 to vector<16x1xf32>
    %110 = arith.divf %108, %109 : vector<16x1xf32>
    %111 = vector.broadcast %110 : vector<16x1xf32> to vector<16x128xf32>
    %112 = arith.subf %104, %111 : vector<16x128xf32>
    %113 = arith.mulf %112, %112 : vector<16x128xf32>
    %cst_58 = arith.constant dense<0.000000e+00> : vector<16xf32>
    %114 = vector.multi_reduction <add>, %113, %cst_58 [1] : vector<16x128xf32> to vector<16xf32>
    %115 = vector.shape_cast %114 : vector<16xf32> to vector<16x1xf32>
    %cst_59 = arith.constant 1.280000e+02 : f32
    %116 = vector.broadcast %cst_59 : f32 to vector<16x1xf32>
    %117 = arith.divf %115, %116 : vector<16x1xf32>
    %cst_60 = arith.constant 9.99999974E-6 : f32
    %118 = vector.broadcast %cst_60 : f32 to vector<16x1xf32>
    %119 = arith.addf %117, %118 : vector<16x1xf32>
    %120 = math.rsqrt %119 : vector<16x1xf32>
    %121 = vector.broadcast %120 : vector<16x1xf32> to vector<16x128xf32>
    %122 = arith.mulf %112, %121 : vector<16x128xf32>
    %123 = vector.broadcast %105 : vector<1x128xf32> to vector<16x128xf32>
    %124 = arith.mulf %122, %123 : vector<16x128xf32>
    %125 = vector.broadcast %106 : vector<1x128xf32> to vector<16x128xf32>
    %126 = arith.addf %124, %125 : vector<16x128xf32>
    %cst_61 = arith.constant 0.000000e+00 : f32
    %127 = vector.broadcast %cst_61 : f32 to vector<16x128xf32>
    %128 = arith.maximumf %126, %127 : vector<16x128xf32>
    %129 = arith.truncf %128 : vector<16x128xf32> to vector<16x128xbf16>
    %c0_62 = arith.constant 0 : index
    %c0_63 = arith.constant 0 : index
    %130 = vector.load %arg7[%c0_62, %c0_63] : memref<128x128xbf16, #tpu.memory_space<vmem>>, vector<128x128xbf16>
    %cst_64 = arith.constant dense<0.000000e+00> : vector<16x128xf32>
    %131 = tpu.matmul %129, %130, %cst_64 {dimension_numbers = #tpu.dot_dimension_numbers<[1], [0], [0], [1], [0, 0, 1, 1], [], []>} : vector<16x128xbf16>, vector<128x128xbf16>, vector<16x128xf32> -> vector<16x128xf32>
    %c3_65 = arith.constant 3 : index
    %c0_66 = arith.constant 0 : index
    %132 = vector.load %arg6[%c3_65, %c0_66] : memref<4x128xf32, #tpu.memory_space<vmem>>, vector<1x128xf32>
    %133 = vector.broadcast %132 : vector<1x128xf32> to vector<16x128xf32>
    %134 = arith.addf %131, %133 : vector<16x128xf32>
    %cst_67 = arith.constant 0.000000e+00 : f32
    %135 = vector.broadcast %cst_67 : f32 to vector<16x1xf32>
    %136 = arith.cmpf oeq, %2, %135 : vector<16x1xf32>
    %c0_68 = arith.constant 0 : index
    %c0_69 = arith.constant 0 : index
    %137 = vector.load %arg8[%c0_68, %c0_69] : memref<4x128xf32, #tpu.memory_space<vmem>>, vector<1x128xf32>
    %c1_70 = arith.constant 1 : index
    %c0_71 = arith.constant 0 : index
    %138 = vector.load %arg8[%c1_70, %c0_71] : memref<4x128xf32, #tpu.memory_space<vmem>>, vector<1x128xf32>
    %139 = vector.shape_cast %136 : vector<16x1xi1> to vector<16x1xi1>
    %140 = vector.broadcast %139 : vector<16x1xi1> to vector<16x128xi1>
    %141 = vector.shape_cast %137 : vector<1x128xf32> to vector<1x128xf32>
    %142 = vector.broadcast %141 : vector<1x128xf32> to vector<16x128xf32>
    %143 = vector.shape_cast %138 : vector<1x128xf32> to vector<1x128xf32>
    %144 = vector.broadcast %143 : vector<1x128xf32> to vector<16x128xf32>
    %145 = arith.select %140, %142, %144 : vector<16x128xi1>, vector<16x128xf32>
    %cst_72 = arith.constant 2.000000e+00 : f32
    %146 = vector.broadcast %cst_72 : f32 to vector<16x1xf32>
    %147 = arith.cmpf oeq, %2, %146 : vector<16x1xf32>
    %c2_73 = arith.constant 2 : index
    %c0_74 = arith.constant 0 : index
    %148 = vector.load %arg8[%c2_73, %c0_74] : memref<4x128xf32, #tpu.memory_space<vmem>>, vector<1x128xf32>
    %149 = vector.shape_cast %147 : vector<16x1xi1> to vector<16x1xi1>
    %150 = vector.broadcast %149 : vector<16x1xi1> to vector<16x128xi1>
    %151 = vector.shape_cast %148 : vector<1x128xf32> to vector<1x128xf32>
    %152 = vector.broadcast %151 : vector<1x128xf32> to vector<16x128xf32>
    %153 = arith.select %150, %152, %145 : vector<16x128xi1>, vector<16x128xf32>
    %cst_75 = arith.constant 3.000000e+00 : f32
    %154 = vector.broadcast %cst_75 : f32 to vector<16x1xf32>
    %155 = arith.cmpf oeq, %2, %154 : vector<16x1xf32>
    %c3_76 = arith.constant 3 : index
    %c0_77 = arith.constant 0 : index
    %156 = vector.load %arg8[%c3_76, %c0_77] : memref<4x128xf32, #tpu.memory_space<vmem>>, vector<1x128xf32>
    %157 = vector.shape_cast %155 : vector<16x1xi1> to vector<16x1xi1>
    %158 = vector.broadcast %157 : vector<16x1xi1> to vector<16x128xi1>
    %159 = vector.shape_cast %156 : vector<1x128xf32> to vector<1x128xf32>
    %160 = vector.broadcast %159 : vector<1x128xf32> to vector<16x128xf32>
    %161 = arith.select %158, %160, %153 : vector<16x128xi1>, vector<16x128xf32>
    %162 = arith.addf %134, %161 : vector<16x128xf32>
    %cst_78 = arith.constant 0.000000e+00 : f32
    %163 = vector.shape_cast %5 : vector<16x1xi1> to vector<16x1xi1>
    %164 = vector.broadcast %163 : vector<16x1xi1> to vector<16x128xi1>
    %165 = vector.broadcast %cst_78 : f32 to vector<16x128xf32>
    %166 = arith.select %164, %162, %165 : vector<16x128xi1>, vector<16x128xf32>
    %c0_79 = arith.constant 0 : index
    %c0_80 = arith.constant 0 : index
    %167 = vector.load %arg9[%c0_79, %c0_80] : memref<16x128xf32, #tpu.memory_space<vmem>>, vector<16x128xf32>
    tpu.vector_store %arg9[%c0_79, %c0_80], %166 {strides = array<i32>} : memref<16x128xf32, #tpu.memory_space<vmem>>, vector<16x128xf32>,
    return
  }
  func.func @transform_0(%arg0: i32) -> (i32, i32) {
    %c0_i32 = arith.constant 0 : i32
    %c0_i32_0 = arith.constant 0 : i32
    return %arg0, %c0_i32 : i32, i32
  }
  func.func @transform_1(%arg0: i32) -> (i32, i32) {
    %c0_i32 = arith.constant 0 : i32
    %c0_i32_0 = arith.constant 0 : i32
    %c0_i32_1 = arith.constant 0 : i32
    return %c0_i32, %c0_i32_0 : i32, i32
  }
  func.func @transform_2(%arg0: i32) -> (i32, i32, i32) {
    %c0_i32 = arith.constant 0 : i32
    %c0_i32_0 = arith.constant 0 : i32
    %c0_i32_1 = arith.constant 0 : i32
    %c0_i32_2 = arith.constant 0 : i32
    return %c0_i32, %c0_i32_0, %c0_i32_1 : i32, i32, i32
  }
  func.func @transform_3(%arg0: i32) -> (i32, i32) {
    %c0_i32 = arith.constant 0 : i32
    %c0_i32_0 = arith.constant 0 : i32
    %c0_i32_1 = arith.constant 0 : i32
    return %c0_i32, %c0_i32_0 : i32, i32
  }
  func.func @transform_4(%arg0: i32) -> (i32, i32, i32) {
    %c0_i32 = arith.constant 0 : i32
    %c0_i32_0 = arith.constant 0 : i32
    %c0_i32_1 = arith.constant 0 : i32
    %c0_i32_2 = arith.constant 0 : i32
    return %c0_i32, %c0_i32_0, %c0_i32_1 : i32, i32, i32
  }
  func.func @transform_5(%arg0: i32) -> (i32, i32) {
    %c0_i32 = arith.constant 0 : i32
    %c0_i32_0 = arith.constant 0 : i32
    %c0_i32_1 = arith.constant 0 : i32
    return %c0_i32, %c0_i32_0 : i32, i32
  }
  func.func @transform_6(%arg0: i32) -> (i32, i32) {
    %c0_i32 = arith.constant 0 : i32
    %c0_i32_0 = arith.constant 0 : i32
    %c0_i32_1 = arith.constant 0 : i32
    return %c0_i32, %c0_i32_0 : i32, i32
  }
  func.func @transform_7(%arg0: i32) -> (i32, i32) {
    %c0_i32 = arith.constant 0 : i32
    %c0_i32_0 = arith.constant 0 : i32
    %c0_i32_1 = arith.constant 0 : i32
    return %c0_i32, %c0_i32_0 : i32, i32
  }
  func.func @transform_8(%arg0: i32) -> (i32, i32) {
    %c0_i32 = arith.constant 0 : i32
    %c0_i32_0 = arith.constant 0 : i32
    return %arg0, %c0_i32 : i32, i32
  }
}

</mosaic_0001>

<bundles_post_ra>
// kernel: tpu_custom_call.1
= control target key start
LH: loop header
LB: loop body
LE: loop exit
PB: predicated region body
PF: predicated region fallthrough
CT: control target
= control target key end

     0   :  { %13 = vsyncpa [#allocation3], 0  ;;  %s2333_s0 = inlined_call_operand.vmem [shape: f32[16,4], index: 0, kind: input, shape index: {}]   ;;  %s2334_s1 = inlined_call_operand.vmem [shape: f32[4,128], index: 1, kind: input, shape index: {}]   ;;  %s2335_s2 = inlined_call_operand.hbm [shape: bf16[2,128,128], index: 2, kind: input, shape index: {}]   ;;  %s2336_s3 = inlined_call_operand.vmem [shape: f32[8,128], index: 3, kind: input, shape index: {}]   ;;  %s2337_s4 = inlined_call_operand.hbm [shape: bf16[2,128,128], index: 4, kind: input, shape index: {}]   ;;  %s2338_s5 = inlined_call_operand.vmem [shape: f32[4,128], index: 5, kind: input, shape index: {}]   ;;  %s2339_s6 = inlined_call_operand.hbm [shape: bf16[128,128], index: 6, kind: input, shape index: {}]   ;;  %s2340_s7 = inlined_call_operand.vmem [shape: f32[4,128], index: 7, kind: input, shape index: {}]   ;;  %s2341_s8 = inlined_call_operand.hbm [shape: f32[16,128], index: 8, kind: output, shape index: {}]  }
   0x1   :  { %14 = vsyncpa [#allocation6], 0 }
   0x2   :  { %15 = vsyncpa [#allocation4], 0  ;;  %s1730_s27 = smov [#allocation5]   ;;  %s1731_s29 = smov [#allocation2]  }
   0x3   :  { %s39_s28 = sshll.u32 %s1730_s27, 4  ;;  %s25_s30 = sshll.u32 %s1731_s29, 4  ;;  %s40_s28 = int_to_ptr.vmem [resolvable:$true] %s39_s28  ;;  %s26_s30 = int_to_ptr.vmem [resolvable:$true] %s25_s30 }
   0x4   :  { %s1652_s9 = scalar_lea.vmem %s40_s28, 2048  ;;  %p1657_p1 = scmp.lt.s32.totalorder %s40_s28, %s40_s28 }
   0x5   :  { %p1653_p0 = scmp.ne.s32.totalorder %s40_s28, %s1652_s9  ;;  %p1658_p2 = scmp.lt.s32.totalorder %s1652_s9, %s1652_s9 }
   0x7   :  { %p1659_p3 = por %p1658_p2, %p1657_p1 }
   0x9   :  { %p1660_p4 = pnand %p1659_p3, %p1653_p0 }
   0xb   :  { %1663 = shalt.err (!%p1660_p4)
}
   0xc   :  { %s1732_s10 = smov 64   ;;  %s1733_s11 = smov 4  }
   0xd   :  { %45 = dma.hbm_to_vmem [thread:$0]  %s2337_s4, 2048, %s40_s28, [#allocation6], %s1732_s10, %s1732_s10, %s1733_s11  }
   0xe   :  { %s1672_s14 = scalar_lea.vmem %s26_s30, 2048  ;;  %p1677_p6 = scmp.lt.s32.totalorder %s26_s30, %s26_s30 }
   0xf   :  { %p1673_p5 = scmp.ne.s32.totalorder %s26_s30, %s1672_s14  ;;  %p1678_p7 = scmp.lt.s32.totalorder %s1672_s14, %s1672_s14 }
  0x11   :  { %p1679_p8 = por %p1678_p7, %p1677_p6 }
  0x13   :  { %p1680_p9 = pnand %p1679_p8, %p1673_p5 }
  0x15   :  { %1683 = shalt.err (!%p1680_p9)
}
  0x16   :  { %31 = dma.hbm_to_vmem [thread:$0]  %s2335_s2, 2048, %s26_s30, [#allocation3], %s1732_s10, %s1732_s10, %s1733_s11  }
  0x17   :  { %s1734_s17 = smov [#allocation7]  }
  0x18   :  { %s53_s18 = sshll.u32 %s1734_s17, 4  ;;  %s54_s18 = int_to_ptr.vmem [resolvable:$true] %s53_s18 }
  0x19   :  { %s1692_s19 = scalar_lea.vmem %s54_s18, 1024  ;;  %p1697_p11 = scmp.lt.s32.totalorder %s54_s18, %s54_s18 }
  0x1a   :  { %p1693_p10 = scmp.ne.s32.totalorder %s54_s18, %s1692_s19  ;;  %p1698_p12 = scmp.lt.s32.totalorder %s1692_s19, %s1692_s19 }
  0x1c   :  { %p1699_p13 = por %p1698_p12, %p1697_p11 }
  0x1e   :  { %p1700_p0 = pnand %p1699_p13, %p1693_p10 }
  0x20   :  { %1703 = shalt.err (!%p1700_p0)
}
  0x21   :  { %59 = dma.hbm_to_vmem [thread:$0]  %s2339_s6, 1024, %s54_s18, [#allocation6], %s1732_s10, %s1732_s10, %s1733_s11  }
  0x22   :  { %1724 = dma.done.wait [#allocation3], 2048  }
  0x23   :  { %1725 = vsyncadd [#allocation3], 4294965248 }
  0x24   :  { %1726 = dma.done.wait [#allocation6], 3072  }
  0x25   :  { %1727 = vsyncadd [#allocation6], 4294964224  ;;  %v1735_v0 = vmov 1   ;;  %v1736_v1 = vmov 0   ;;  %v72_v2 = vld [vmem:[%s2333_s0] sm:$0xff]  ;;  %v73_v3 = vld [vmem:[%s2333_s0 + $0x8] sm:$0xff] }
  0x26   :  { %1569 = vset.pattern.permute.xlu1 %v1735_v0  ;;  %1568 = vset.pattern.permute.xlu0 %v1736_v1  ;;  %v1574_v4 = vld [vmem:[#allocation2 + $0x38] sm:$0xff]   ;;  %v1737_v6 = vmov 0.0   ;;  %v1576_v7 = vld [vmem:[#allocation2 + $0x30] sm:$0xff]   ;;  %v1578_v9 = vld [vmem:[#allocation2 + $0x28] sm:$0xff]   ;;  %vm1738_vm0 = vmmov 0  }
  0x27   :  { %309 = vperm.xlu1 %1569, %v72_v2   ;;  %80 = vperm.xlu0 %1568, %v72_v2   ;;  %v1575_v5 = vld [vmem:[#allocation2 + $0x78] sm:$0xff]   ;;  %v1577_v8 = vld [vmem:[#allocation2 + $0x70] sm:$0xff]   ;;  %v1579_v10 = vld [vmem:[#allocation2 + $0x68] sm:$0xff]   ;;  %v1739_v0 = vmov 920167782  }
  0x28   :  { %1432 = vmatprep.subr.bf16.mxu0 %v1737_v6  ;;  %1452 = vmatprep.subr.bf16.mxu1 %v1737_v6  ;;  %v1580_v11 = vld [vmem:[#allocation2 + $0x20] sm:$0xff]   ;;  %v1582_v13 = vld [vmem:[#allocation2 + $0x18] sm:$0xff]   ;;  %v1584_v15 = vld [vmem:[#allocation2 + $0x10] sm:$0xff]  }
  0x29   :  { %1433 = vmatpush3.bf16.msra.mxu0 %v1574_v4  ;;  %1453 = vmatpush3.bf16.msra.mxu1 %v1575_v5  ;;  %v1581_v12 = vld [vmem:[#allocation2 + $0x60] sm:$0xff]   ;;  %v1583_v14 = vld [vmem:[#allocation2 + $0x58] sm:$0xff]   ;;  %v1585_v16 = vld [vmem:[#allocation2 + $0x50] sm:$0xff]  }
  0x2a   :  { %1434 = vmatprep.subr.bf16.mxu0 %v1737_v6  ;;  %1454 = vmatprep.subr.bf16.mxu1 %v1737_v6  ;;  %v1586_v17 = vld [vmem:[#allocation2 + $0x8] sm:$0xff]   ;;  %v1588_v19 = vld [vmem:[#allocation2] sm:$0xff]  }
  0x2b   :  { %313 = vperm.xlu1 %1569, %v73_v3   ;;  %85 = vperm.xlu0 %1568, %v73_v3   ;;  %v1587_v18 = vld [vmem:[#allocation2 + $0x48] sm:$0xff]   ;;  %v1589_v20 = vld [vmem:[#allocation2 + $0x40] sm:$0xff]   ;;  %v1740_v3 = vmov 1326507024  }
  0x2c   :  { %1448 = vmatprep.mubr.msk.bf16.mxu0 %vm1738_vm0, %v1737_v6  ;;  %1468 = vmatprep.mubr.msk.bf16.mxu1 %vm1738_vm0, %v1737_v6  ;;  %v1322_v21 = vld [vmem:[%s2334_s1 + $0x1] ss:$0 sm:$0xff]  ;;  %v1312_v22 = vld [vmem:[%s2334_s1] ss:$0 sm:$0xff]  ;;  %v1313_v23 = vld [vmem:[%s2334_s1 + $0x2] ss:$0 sm:$0xff] }
  0x2d   :  { %1435 = vmatpush3.bf16.msra.mxu0 %v1576_v7  ;;  %1455 = vmatpush3.bf16.msra.mxu1 %v1577_v8  ;;  %v1741_v8 = vmov 2102212464  }
  0x2e   :  { %1436 = vmatprep.subr.bf16.mxu0 %v1737_v6  ;;  %1456 = vmatprep.subr.bf16.mxu1 %v1737_v6 }
  0x31   :  { %1437 = vmatpush3.bf16.msra.mxu0 %v1578_v9  ;;  %1457 = vmatpush3.bf16.msra.mxu1 %v1579_v10 }
  0x32   :  { %1438 = vmatprep.subr.bf16.mxu0 %v1737_v6  ;;  %1458 = vmatprep.subr.bf16.mxu1 %v1737_v6 }
  0x35   :  { %1439 = vmatpush3.bf16.msra.mxu0 %v1580_v11  ;;  %1459 = vmatpush3.bf16.msra.mxu1 %v1581_v12 }
  0x36   :  { %1440 = vmatprep.subr.bf16.mxu0 %v1737_v6  ;;  %1460 = vmatprep.subr.bf16.mxu1 %v1737_v6 }
  0x39   :  { %1441 = vmatpush3.bf16.msra.mxu0 %v1582_v13  ;;  %1461 = vmatpush3.bf16.msra.mxu1 %v1583_v14 }
  0x3a   :  { %1442 = vmatprep.subr.bf16.mxu0 %v1737_v6  ;;  %1462 = vmatprep.subr.bf16.mxu1 %v1737_v6 }
  0x3d   :  { %1443 = vmatpush3.bf16.msra.mxu0 %v1584_v15  ;;  %1463 = vmatpush3.bf16.msra.mxu1 %v1585_v16 }
  0x3e   :  { %1444 = vmatprep.subr.bf16.mxu0 %v1737_v6  ;;  %1464 = vmatprep.subr.bf16.mxu1 %v1737_v6 }
  0x41   :  { %1445 = vmatpush3.bf16.msra.mxu0 %v1586_v17  ;;  %1465 = vmatpush3.bf16.msra.mxu1 %v1587_v18 }
  0x42   :  { %1446 = vmatprep.subr.bf16.mxu0 %v1737_v6  ;;  %1466 = vmatprep.subr.bf16.mxu1 %v1737_v6 }
  0x45   :  { %1447 = vmatpush3.bf16.msra.mxu0 %v1588_v19  ;;  %1467 = vmatpush3.bf16.msra.mxu1 %v1589_v20 }
  0x46   :  { %1492 = vmatprep.subr.bf16.mxu1 %v1737_v6  ;;  %1472 = vmatprep.subr.bf16.mxu0 %v1737_v6 }
  0xa2   :  { %v1842_v24 = vpop.permute.xlu1 %309  ;;  %v1844_v25 = vpop.permute.xlu0 %80 }
  0xa3   :  { %v320_v26 = vmul.f32 %v1322_v21, %v1842_v24  ;;  %v92_v27 = vmul.f32 %v1312_v22, %v1844_v25 }
  0xa5   :  { %v1848_v28 = vsub.f32 %v320_v26, %v1313_v23  ;;  %v1850_v29 = vsub.f32 %v92_v27, %v1313_v23 }
  0xa6   :  { %v1852_v30 = vpop.permute.xlu1 %313  ;;  %v1854_v31 = vpop.permute.xlu0 %85 }
  0xa7   :  { %v327_v32 = vand.u32 2139095040, %v1848_v28  ;;  %v103_v33 = vand.u32 2139095040, %v1850_v29  ;;  %v321_v34 = vmul.f32 %v1322_v21, %v1852_v30  ;;  %v93_v35 = vmul.f32 %v1312_v22, %v1854_v31 }
  0xa8   :  { %v100_v47 = vand.u32 2147483647, %v1850_v29  ;;  %v324_v63 = vand.u32 2147483647, %v1848_v28 }
  0xa9   :  { %v328_v36 = vshrl.u32 %v327_v32, 23  ;;  %v104_v37 = vshrl.u32 %v103_v33, 23  ;;  %v1860_v38 = vsub.f32 %v321_v34, %v1313_v23  ;;  %v1862_v39 = vsub.f32 %v93_v35, %v1313_v23 }
  0xaa   :  { %v107_v56 = vand.u32 8388607, %v100_v47  ;;  %v1907_v26 = vand.u32 8388607, %v324_v63 }
  0xab   :  { %v1323_v40 = vadd.s32 4294967169, %v328_v36  ;;  %v1314_v41 = vadd.s32 4294967169, %v104_v37  ;;  %v430_v42 = vand.u32 2139095040, %v1860_v38  ;;  %v206_v43 = vand.u32 2139095040, %v1862_v39 }
  0xac   :  { %v203_v49 = vand.u32 2147483647, %v1862_v39  ;;  %v108_v62 = vor.u32 8388608, %v107_v56 }
  0xad   :  { %v334_v44 = vadd.s32 1, %v1323_v40  ;;  %v110_v45 = vadd.s32 1, %v1314_v41  ;;  %v431_v46 = vshrl.u32 %v430_v42, 23  ;;  %v207_v48 = vshrl.u32 %v206_v43, 23 }
  0xae   :  { %v210_v58 = vand.u32 8388607, %v203_v49  ;;  %v1898_v20 = vshll.u32 %v108_v62, 8  ;;  %v1742_v40 = vmov 683565275  }
  0xaf   :  { %vm335_vm1 = vcmp.gt.s32.totalorder %v334_v44, 0  ;;  %vm111_vm2 = vcmp.gt.s32.totalorder %v110_v45, 0  ;;  %v1318_v52 = vadd.s32 4294967169, %v207_v48  ;;  %v1327_v55 = vadd.s32 4294967169, %v431_v46 }
  0xb0   :  { %v336_v50 = vsel %vm335_vm1, %v334_v44, 0  ;;  %v112_v51 = vsel %vm111_vm2, %v110_v45, 0  ;;  %v211_v7 = vor.u32 8388608, %v210_v58  ;;  %v1743_v42 = vmov 2475754826  }
  0xb1   :  { %v1868_v53 = vand.u32 31, %v336_v50  ;;  %v114_v54 = vand.u32 31, %v112_v51  ;;  %v213_v57 = vadd.s32 1, %v1318_v52  ;;  %v437_v61 = vadd.s32 1, %v1327_v55 }
  0xb2   :  { %v113_v10 = vshrl.u32 %v112_v51, 5  ;;  %v1896_v19 = vshrl.u32 %v336_v50, 5  ;;  %v1903_v23 = vshll.u32 %v211_v7, 8  ;;  %v1744_v45 = vmov 2131351028  }
  0xb3   :  { %v1875_v59 = vsub.s32 32, %v1868_v53  ;;  %v115_v60 = vsub.s32 32, %v114_v54  ;;  %vm214_vm3 = vcmp.gt.s32.totalorder %v213_v57, 0  ;;  %v350_v9 = vshll.u32 %v1741_v8, %v1868_v53 }
  0xb4   :  { %v215_v5 = vsel %vm214_vm3, %v213_v57, 0  ;;  %v126_v11 = vshll.u32 %v1741_v8, %v114_v54  ;;  %v129_v12 = vshll.u32 %v1739_v0, %v114_v54  ;;  %v1888_v14 = vshll.u32 %v1739_v0, %v1868_v53 }
  0xb5   :  { %v127_v2 = vshrl.u32 %v1739_v0, %v115_v60  ;;  %v130_v4 = vshrl.u32 %v1740_v3, %v115_v60  ;;  %v351_v13 = vshrl.u32 %v1739_v0, %v1875_v59  ;;  %v1892_v15 = vshrl.u32 %v1740_v3, %v1875_v59 }
  0xb6   :  { %v1894_v16 = vand.u32 31, %v215_v5  ;;  %vm438_vm4 = vcmp.gt.s32.totalorder %v437_v61, 0  ;;  %v1900_v21 = vshrl.u32 %v215_v5, 5  ;;  %vm135_vm5 = vcmp.lt.s32.totalorder %v113_v10, 4 }
  0xb7   :  { %v128_v17 = vor.u32 %v127_v2, %v126_v11  ;;  %v131_v18 = vor.u32 %v130_v4, %v129_v12  ;;  %v1909_v27 = vor.u32 %v351_v13, %v350_v9  ;;  %v355_v32 = vor.u32 %v1892_v15, %v1888_v14 }
  0xb8   :  { %v218_v22 = vsub.s32 32, %v1894_v16  ;;  %v1913_v33 = vsel %vm438_vm4, %v437_v61, 0  ;;  %v117_v41 = vshll.u32 %v1742_v40, %v114_v54  ;;  %v118_v43 = vshrl.u32 %v1743_v42, %v115_v60 }
  0xb9   :  { %v141_v34 = vsel %vm135_vm5, %v128_v17, 920167782  ;;  %v145_v35 = vsel %vm135_vm5, %v131_v18, 1326507024  ;;  %v120_v44 = vshll.u32 %v1743_v42, %v114_v54  ;;  %v121_v46 = vshrl.u32 %v1744_v45, %v115_v60 }
  0xba   :  { %v230_v36 = vshrl.u32 %v1739_v0, %v218_v22  ;;  %v233_v37 = vshrl.u32 %v1740_v3, %v218_v22  ;;  %v229_v48 = vshll.u32 %v1741_v8, %v1894_v16  ;;  %v232_v50 = vshll.u32 %v1739_v0, %v1894_v16 }
  0xbb   :  { %vm238_vm6 = vcmp.lt.s32.totalorder %v1900_v21, 4  ;;  %v116_v51 = vshrl.u32 %v1742_v40, %v115_v60  ;;  %v119_v52 = vor.u32 %v118_v43, %v117_v41  ;;  %v122_v55 = vor.u32 %v121_v46, %v120_v44 }
  0xbc   :  { %v123_v56 = vshll.u32 %v1744_v45, %v114_v54  ;;  %v124_v57 = vshrl.u32 %v1741_v8, %v115_v60  ;;  %v231_v58 = vor.u32 %v230_v36, %v229_v48  ;;  %v234_v61 = vor.u32 %v233_v37, %v232_v50 }
  0xbd   :  { %vm132_vm7 = vcmp.lt.s32.totalorder %v113_v10, 1  ;;  %vm134_vm8 = vcmp.lt.s32.totalorder %v113_v10, 3  ;;  %vm133_vm9 = vcmp.lt.s32.totalorder %v113_v10, 2  ;;  %v220_v7 = vshll.u32 %v1742_v40, %v1894_v16 }
  0xbe   :  { %v125_v62 = vor.u32 %v124_v57, %v123_v56  ;;  %v140_v2 = vsel %vm132_vm7, %v119_v52, %v122_v55  ;;  %v146_v4 = vsel %vm134_vm8, %v128_v17, %v145_v35  ;;  %v136_v5 = vsel %vm132_vm7, %v116_v51, %v119_v52 }
  0xbf   :  { %v221_v9 = vshrl.u32 %v1743_v42, %v218_v22  ;;  %v223_v11 = vshll.u32 %v1743_v42, %v1894_v16  ;;  %v224_v13 = vshrl.u32 %v1744_v45, %v218_v22  ;;  %vm359_vm10 = vcmp.lt.s32.totalorder %v1896_v19, 4 }
  0xc0   :  { %v137_v54 = vsel %vm135_vm5, %v125_v62, 2102212464  ;;  %v142_v60 = vsel %vm134_vm8, %v125_v62, %v141_v34  ;;  %v144_v12 = vsel %vm132_vm7, %v122_v55, %v125_v62  ;;  %v248_v34 = vsel %vm238_vm6, %v234_v61, 1326507024 }
  0xc1   :  { %v138_v18 = vsel %vm134_vm8, %v122_v55, %v137_v54  ;;  %v143_v36 = vsel %vm133_vm9, %v140_v2, %v142_v60  ;;  %v147_v17 = vsel %vm133_vm9, %v144_v12, %v146_v4  ;;  %v222_v35 = vor.u32 %v221_v9, %v220_v7 }
  0xc2   :  { %v139_v37 = vsel %vm133_vm9, %v136_v5, %v138_v18  ;;  %v1943_v41 = vmul.u32.u64.low %v1898_v20, %v147_v17  ;;  %v1944_v43 = vmul.u32.u64.high %v1898_v20, %v147_v17, %v1943_v41  ;;  %v225_v44 = vor.u32 %v224_v13, %v223_v11 }
  0xc3   :  { %v1949_v46 = vmul.u32.u64.low %v1898_v20, %v143_v36  ;;  %v1950_v48 = vmul.u32.u64.high %v1898_v20, %v143_v36, %v1949_v46  ;;  %v219_v50 = vshrl.u32 %v1742_v40, %v218_v22  ;;  %v244_v51 = vsel %vm238_vm6, %v231_v58, 920167782 }
  0xc4   :  { %v226_v10 = vshll.u32 %v1744_v45, %v1894_v16  ;;  %v227_v52 = vshrl.u32 %v1741_v8, %v218_v22  ;;  %vm235_vm11 = vcmp.lt.s32.totalorder %v1900_v21, 1  ;;  %v155_v55 = vmul.u32 %v1898_v20, %v139_v37 }
  0xc5   :  { %vm236_vm12 = vcmp.lt.s32.totalorder %v1900_v21, 2  ;;  %vm237_vm13 = vcmp.lt.s32.totalorder %v1900_v21, 3  ;;  %v239_v56 = vsel %vm235_vm11, %v219_v50, %v222_v35  ;;  %vm157_vm14 = vc.u32 %v1944_v43, %v1949_v46 }
  0xc6   :  { %v228_v57 = vor.u32 %v227_v52, %v226_v10  ;;  %v243_v16 = vsel %vm235_vm11, %v222_v35, %v225_v44  ;;  %v249_v61 = vsel %vm237_vm13, %v231_v58, %v248_v34  ;;  %v158_v22 = vadd.s32 1, %v1950_v48 }
  0xc7   :  { %v341_v20 = vshll.u32 %v1742_v40, %v1868_v53  ;;  %v342_v62 = vshrl.u32 %v1743_v42, %v1875_v59  ;;  %v344_v2 = vshll.u32 %v1743_v42, %v1868_v53  ;;  %v345_v58 = vshrl.u32 %v1744_v45, %v1875_v59 }
  0xc8   :  { %v240_v4 = vsel %vm238_vm6, %v228_v57, 2102212464  ;;  %v245_v5 = vsel %vm237_vm13, %v228_v57, %v244_v51  ;;  %v247_v7 = vsel %vm235_vm11, %v225_v44, %v228_v57  ;;  %v159_v9 = vsel %vm157_vm14, %v158_v22, %v1950_v48 }
  0xc9   :  { %v241_v11 = vsel %vm237_vm13, %v225_v44, %v240_v4  ;;  %v246_v54 = vsel %vm236_vm12, %v243_v16, %v245_v5  ;;  %v250_v60 = vsel %vm236_vm12, %v247_v7, %v249_v61  ;;  %v160_v12 = vadd.s32 %v159_v9, %v155_v55 }
  0xca   :  { %v242_v13 = vsel %vm236_vm12, %v239_v56, %v241_v11  ;;  %v1990_v18 = vmul.u32.u64.low %v1903_v23, %v250_v60  ;;  %v1991_v36 = vmul.u32.u64.high %v1903_v23, %v250_v60, %v1990_v18  ;;  %v365_v17 = vsel %vm359_vm10, %v1909_v27, 920167782 }
  0xcb   :  { %v1997_v35 = vmul.u32.u64.low %v1903_v23, %v246_v54  ;;  %v1998_v37 = vmul.u32.u64.high %v1903_v23, %v246_v54, %v1997_v35  ;;  %v343_v41 = vor.u32 %v342_v62, %v341_v20  ;;  %v161_v44 = vadd.s32 536870912, %v160_v12 }
  0xcc   :  { %v346_v34 = vor.u32 %v345_v58, %v344_v2  ;;  %v347_v21 = vshll.u32 %v1744_v45, %v1868_v53  ;;  %v348_v48 = vshrl.u32 %v1741_v8, %v1875_v59  ;;  %v369_v50 = vsel %vm359_vm10, %v355_v32, 1326507024 }
  0xcd   :  { %v258_v51 = vmul.u32 %v1903_v23, %v242_v13  ;;  %v332_v10 = vor.u32 8388608, %v1907_v26  ;;  %v340_v52 = vshrl.u32 %v1742_v40, %v1875_v59  ;;  %v2014_v55 = vshrl.u32 %v161_v44, 30 }
  0xce   :  { %vm260_vm15 = vc.u32 %v1991_v36, %v1997_v35  ;;  %v349_v53 = vor.u32 %v348_v48, %v347_v21  ;;  %vm356_vm1 = vcmp.lt.s32.totalorder %v1896_v19, 1  ;;  %v261_v14 = vadd.s32 1, %v1998_v37 }
  0xcf   :  { %vm357_vm2 = vcmp.lt.s32.totalorder %v1896_v19, 2  ;;  %vm358_vm3 = vcmp.lt.s32.totalorder %v1896_v19, 3  ;;  %v364_v15 = vsel %vm356_vm1, %v343_v41, %v346_v34  ;;  %v163_v23 = vshll.u32 %v2014_v55, 30 }
  0xd0   :  { %v361_v59 = vsel %vm359_vm10, %v349_v53, 2102212464  ;;  %v366_v26 = vsel %vm358_vm3, %v349_v53, %v365_v17  ;;  %v370_v32 = vsel %vm358_vm3, %v1909_v27, %v369_v50  ;;  %v262_v56 = vsel %vm260_vm15, %v261_v14, %v1998_v37 }
  0xd1   :  { %v367_v57 = vsel %vm357_vm2, %v364_v15, %v366_v26  ;;  %v368_v16 = vsel %vm356_vm1, %v346_v34, %v349_v53  ;;  %v372_v61 = vshll.u32 %v332_v10, 8  ;;  %v441_v22 = vand.u32 31, %v1913_v33 }
  0xd2   :  { %v164_v20 = vsub.s32 %v160_v12, %v163_v23  ;;  %v263_v62 = vadd.s32 %v262_v56, %v258_v51  ;;  %v360_v2 = vsel %vm356_vm1, %v340_v52, %v343_v41  ;;  %v362_v4 = vsel %vm358_vm3, %v346_v34, %v361_v59 }
  0xd3   :  { %v371_v27 = vsel %vm357_vm2, %v368_v16, %v370_v32  ;;  %v2038_v5 = vmul.u32.u64.low %v372_v61, %v367_v57  ;;  %v2039_v7 = vmul.u32.u64.high %v372_v61, %v367_v57, %v2038_v5  ;;  %v363_v12 = vsel %vm357_vm2, %v360_v2, %v362_v4 }
  0xd4   :  { %v166_v58 = vsub.s32 0, %v164_v20  ;;  %v264_v9 = vadd.s32 536870912, %v263_v62  ;;  %v2042_v11 = vmul.u32.u64.low %v372_v61, %v371_v27  ;;  %v2043_v54 = vmul.u32.u64.high %v372_v61, %v371_v27, %v2042_v11 }
  0xd5   :  { %v2047_v13 = vsub.s32 32, %v441_v22  ;;  %v382_v17 = vadd.s32 1, %v2039_v7  ;;  %v379_v44 = vmul.u32 %v372_v61, %v363_v12  ;;  %v2056_v34 = vshrl.u32 %v1913_v33, 5 }
  0xd6   :  { %v1315_v60 = vmin.u32 %v166_v58, %v164_v20  ;;  %v2049_v18 = vshrl.u32 %v264_v9, 30  ;;  %vm381_vm4 = vc.u32 %v2043_v54, %v2038_v5  ;;  %v453_v52 = vshll.u32 %v1741_v8, %v441_v22 }
  0xd7   :  { %v383_v19 = vsel %vm381_vm4, %v382_v17, %v2039_v7  ;;  %v454_v48 = vshrl.u32 %v1739_v0, %v2047_v13  ;;  %v457_v50 = vshrl.u32 %v1740_v3, %v2047_v13  ;;  %v456_v53 = vshll.u32 %v1739_v0, %v441_v22 }
  0xd8   :  { %v168_v37 = vclz %v1315_v60  ;;  %v266_v41 = vshll.u32 %v2049_v18, 30  ;;  %v384_v10 = vadd.s32 %v383_v19, %v379_v44  ;;  %v156_v23 = vadd.s32 %v1949_v46, %v1944_v43 }
  0xd9   :  { %v427_v32 = vand.u32 2147483647, %v1860_v38  ;;  %v455_v3 = vor.u32 %v454_v48, %v453_v52  ;;  %v458_v56 = vor.u32 %v457_v50, %v456_v53  ;;  %vm462_vm6 = vcmp.lt.s32.totalorder %v2056_v34, 4 }
  0xda   :  { %v1316_v21 = vadd.s32 4294967294, %v168_v37  ;;  %v2063_v51 = vsub.s32 %v263_v62, %v266_v41  ;;  %v385_v15 = vadd.s32 536870912, %v384_v10  ;;  %v445_v4 = vshrl.u32 %v1743_v42, %v2047_v13 }
  0xdb   :  { %v448_v43 = vshrl.u32 %v1744_v45, %v2047_v13  ;;  %v451_v46 = vshrl.u32 %v1741_v8, %v2047_v13  ;;  %vm102_vm7 = vcmp.lt.s32.totalorder %v1850_v29, 0  ;;  %v444_v11 = vshll.u32 %v1742_v40, %v441_v22 }
  0xdc   :  { %vm1317_vm5 = vcmp.lt.s32.totalorder %v1316_v21, 0  ;;  %v269_v33 = vsub.s32 0, %v2063_v51  ;;  %v2073_v62 = vshrl.u32 %v385_v15, 30  ;;  %v447_v60 = vshll.u32 %v1743_v42, %v441_v22 }
  0xdd   :  { %v171_v14 = vsel %vm1317_vm5, 0, %v1316_v21  ;;  %v450_v12 = vshll.u32 %v1744_v45, %v441_v22  ;;  %v468_v17 = vsel %vm462_vm6, %v455_v3, 920167782  ;;  %v472_v8 = vsel %vm462_vm6, %v458_v56, 1326507024 }
  0xde   :  { %v172_v59 = vsub.s32 32, %v171_v14  ;;  %v176_v26 = vsub.s32 4294967266, %v171_v14  ;;  %v1319_v57 = vmin.u32 %v269_v33, %v2063_v51  ;;  %v173_v16 = vshll.u32 %v164_v20, %v171_v14 }
  0xdf   :  { %v387_v58 = vshll.u32 %v2073_v62, 30  ;;  %v434_v20 = vand.u32 8388607, %v427_v32  ;;  %vm2094_vm8 = vcmp.le.f32.partialorder %v100_v47, 0.7853982  ;;  %v446_v21 = vor.u32 %v445_v4, %v444_v11 }
  0xe0   :  { %v174_v61 = vshrl.u32 %v156_v23, %v172_v59  ;;  %v177_v0 = vadd.s32 127, %v176_v26  ;;  %v271_v2 = vclz %v1319_v57  ;;  %v449_v42 = vor.u32 %v448_v43, %v447_v60 }
  0xe1   :  { %v2098_v44 = vsub.s32 %v384_v10, %v387_v58  ;;  %v452_v19 = vor.u32 %v451_v46, %v450_v12  ;;  %v259_v52 = vadd.s32 %v1997_v35, %v1991_v36  ;;  %v435_v14 = vor.u32 8388608, %v434_v20 }
  0xe2   :  { %v175_v27 = vor.u32 %v174_v61, %v173_v16  ;;  %v178_v7 = vshll.u32 %v177_v0, 23  ;;  %v1320_v9 = vadd.s32 4294967294, %v271_v2  ;;  %vm459_vm10 = vcmp.lt.s32.totalorder %v2056_v34, 1 }
  0xe3   :  { %v390_v50 = vsub.s32 0, %v2098_v44  ;;  %vm460_vm11 = vcmp.lt.s32.totalorder %v2056_v34, 2  ;;  %vm461_vm12 = vcmp.lt.s32.totalorder %v2056_v34, 3  ;;  %v467_v36 = vsel %vm459_vm10, %v446_v21, %v449_v42 }
  0xe4   :  { %v179_v41 = vor.u32 4788187, %v178_v7  ;;  %vm1321_vm9 = vcmp.lt.s32.totalorder %v1320_v9, 0  ;;  %v182_v22 = vcvt.s32.f32 %v175_v27  ;;  %v471_v35 = vsel %vm459_vm10, %v449_v42, %v452_v19 }
  0xe5   :  { %v274_v48 = vsel %vm1321_vm9, 0, %v1320_v9  ;;  %v1324_v15 = vmin.u32 %v390_v50, %v2098_v44  ;;  %v469_v61 = vsel %vm461_vm12, %v452_v19, %v468_v17  ;;  %v475_v43 = vshll.u32 %v435_v14, 8 }
  0xe6   :  { %v180_v45 = vand.u32 2147483647, %v179_v41  ;;  %v275_v53 = vsub.s32 32, %v274_v48  ;;  %v279_v47 = vsub.s32 4294967266, %v274_v48  ;;  %v276_v10 = vshll.u32 %v2063_v51, %v274_v48 }
  0xe7   :  { %v392_v56 = vclz %v1324_v15  ;;  %v473_v51 = vsel %vm461_vm12, %v455_v3, %v472_v8  ;;  %v443_v7 = vshrl.u32 %v1742_v40, %v2047_v13  ;;  %v464_v58 = vsel %vm462_vm6, %v452_v19, 2102212464 }
  0xe8   :  { %v183_v33 = vmul.f32 %v182_v22, %v180_v45  ;;  %v277_v23 = vshrl.u32 %v259_v52, %v275_v53  ;;  %v280_v59 = vadd.s32 127, %v279_v47  ;;  %v474_v4 = vsel %vm460_vm11, %v471_v35, %v473_v51 }
  0xe9   :  { %v1325_v2 = vadd.s32 4294967294, %v392_v56  ;;  %v470_v3 = vsel %vm460_vm11, %v467_v36, %v469_v61  ;;  %v2129_v20 = vmul.u32.u64.low %v475_v43, %v474_v4  ;;  %v2130_v9 = vmul.u32.u64.high %v475_v43, %v474_v4, %v2129_v20 }
  0xea   :  { %v184_v26 = vxor.u32 2147483648, %v183_v33  ;;  %v278_v57 = vor.u32 %v277_v23, %v276_v10  ;;  %v281_v16 = vshll.u32 %v280_v59, 23  ;;  %v463_v17 = vsel %vm459_vm10, %v443_v7, %v446_v21 }
  0xeb   :  { %vm1326_vm13 = vcmp.lt.s32.totalorder %v1325_v2, 0  ;;  %v465_v40 = vsel %vm461_vm12, %v449_v42, %v464_v58  ;;  %v2136_v8 = vmul.u32.u64.low %v475_v43, %v470_v3  ;;  %v2137_v41 = vmul.u32.u64.high %v475_v43, %v470_v3, %v2136_v8 }
  0xec   :  { %v185_v0 = vsel %vm102_vm7, %v184_v26, %v183_v33  ;;  %v282_v27 = vor.u32 4788187, %v281_v16  ;;  %v285_v60 = vcvt.s32.f32 %v278_v57  ;;  %v395_v12 = vsel %vm1326_vm13, 0, %v1325_v2 }
  0xed   :  { %v188_v46 = vsel %vm2094_vm8, %v1850_v29, %v185_v0  ;;  %v400_v19 = vsub.s32 4294967266, %v395_v12  ;;  %v466_v22 = vsel %vm460_vm11, %v463_v17, %v465_v40  ;;  %vm205_vm14 = vcmp.lt.s32.totalorder %v1862_v39, 0 }
  0xee   :  { %1614 = vcosq.f32 %v188_v46  ;;  %v283_v11 = vand.u32 2147483647, %v282_v27  ;;  %vm484_vm15 = vc.u32 %v2130_v9, %v2136_v8  ;;  %v186_v21 = vsub.s32 4, %v2014_v55 }
  0xef   :  { %1616 = vsinq.f32 %v188_v46  ;;  %vm2148_vm1 = vcmp.le.f32.partialorder %v203_v49, 0.7853982  ;;  %v485_v50 = vadd.s32 1, %v2137_v41  ;;  %v401_v52 = vadd.s32 127, %v400_v19 }
  0xf0   :  { %v286_v13 = vmul.f32 %v285_v60, %v283_v11  ;;  %v482_v53 = vmul.u32 %v475_v43, %v466_v22  ;;  %v289_v14 = vsub.s32 4, %v2049_v18  ;;  %v396_v49 = vsub.s32 32, %v395_v12 }
  0xf1   :  { %v486_v47 = vsel %vm484_vm15, %v485_v50, %v2137_v41  ;;  %v187_v15 = vsel %vm102_vm7, %v186_v21, %v2014_v55  ;;  %v380_v10 = vadd.s32 %v2038_v5, %v2043_v54  ;;  %v402_v23 = vshll.u32 %v401_v52, 23 }
  0xf2   :  { %v287_v45 = vxor.u32 2147483648, %v286_v13  ;;  %v487_v33 = vadd.s32 %v486_v47, %v482_v53  ;;  %v189_v56 = vsel %vm2094_vm8, 0, %v187_v15  ;;  %v290_v36 = vsel %vm205_vm14, %v289_v14, %v2049_v18 }
  0xf3   :  { %v398_v35 = vshrl.u32 %v380_v10, %v396_v49  ;;  %v397_v61 = vshll.u32 %v2098_v44, %v395_v12  ;;  %v403_v55 = vor.u32 4788187, %v402_v23  ;;  %v193_v5 = vand.u32 3, %v189_v56 }
  0xf4   :  { %v288_v48 = vsel %vm205_vm14, %v287_v45, %v286_v13  ;;  %v488_v59 = vadd.s32 536870912, %v487_v33  ;;  %v292_v54 = vsel %vm2148_vm1, 0, %v290_v36  ;;  %vm192_vm8 = vweird.f32 %v1850_v29 }
  0xf5   :  { %v291_v34 = vsel %vm2148_vm1, %v1862_v39, %v288_v48  ;;  %v399_v2 = vor.u32 %v398_v35, %v397_v61  ;;  %v296_v43 = vand.u32 3, %v292_v54  ;;  %v404_v46 = vand.u32 2147483647, %v403_v55 }
  0xf6   :  { %1618 = vcosq.f32 %v291_v34  ;;  %v2170_v57 = vshrl.u32 %v488_v59, 30  ;;  %vm195_vm2 = vcmp.eq.s32.totalorder %v193_v5, 0  ;;  %vm198_vm3 = vcmp.eq.s32.totalorder %v193_v5, 2 }
  0xf7   :  { %1620 = vsinq.f32 %v291_v34  ;;  %v406_v44 = vcvt.s32.f32 %v399_v2  ;;  %vm194_vm4 = vcmp.lt.s32.totalorder %v193_v5, 2  ;;  %vm301_vm5 = vcmp.eq.s32.totalorder %v296_v43, 2 }
  0xf8   :  { %v490_v51 = vshll.u32 %v2170_v57, 30  ;;  %vm298_vm6 = vcmp.eq.s32.totalorder %v296_v43, 0  ;;  %vm297_vm7 = vcmp.lt.s32.totalorder %v296_v43, 2  ;;  %vm295_vm9 = vweird.f32 %v1862_v39 }
  0xf9   :  { %v407_v12 = vmul.f32 %v406_v44, %v404_v46  ;;  %v483_v34 = vadd.s32 %v2136_v8, %v2130_v9  ;;  %vm326_vm11 = vcmp.lt.s32.totalorder %v1848_v28, 0  ;;  %vm2187_vm12 = vcmp.le.f32.partialorder %v324_v63, 0.7853982 }
  0xfa   :  { %v491_v4 = vsub.s32 %v487_v33, %v490_v51  ;;  %vm429_vm13 = vcmp.lt.s32.totalorder %v1860_v38, 0  ;;  %v410_v63 = vsub.s32 4, %v2073_v62  ;;  %vm428_vm14 = vcmp.le.f32.partialorder %v427_v32, 0.7853982 }
  0xfb   :  { %v1615_v26 = vpop.eup %1614  ;;  %v408_v42 = vxor.u32 2147483648, %v407_v12  ;;  %v513_v35 = vsub.s32 4, %v2170_v57 }
  0xfc   :  { %v1617_v16 = vpop.eup %1616  ;;  %v199_v37 = vxor.u32 2147483648, %v1615_v26  ;;  %v493_v18 = vsub.s32 0, %v491_v4 }
  0xfd   :  { %v196_v0 = vxor.u32 2147483648, %v1617_v16  ;;  %v409_v29 = vsel %vm326_vm11, %v408_v42, %v407_v12  ;;  %v514_v51 = vsel %vm429_vm13, %v513_v35, %v2170_v57 }
  0xfe   :  { %v200_v58 = vsel %vm198_vm3, %v199_v37, %v1617_v16  ;;  %v1328_v3 = vmin.u32 %v493_v18, %v491_v4  ;;  %v412_v33 = vsel %vm2187_vm12, %v1848_v28, %v409_v29  ;;  %v411_v16 = vsel %vm326_vm11, %v410_v63, %v2073_v62 }
  0xff   :  { %v197_v7 = vsel %vm195_vm2, %v1615_v26, %v196_v0  ;;  %1622 = vcosq.f32 %v412_v33  ;;  %v413_v55 = vsel %vm2187_vm12, 0, %v411_v16  ;;  %v516_v32 = vsel %vm428_vm14, 0, %v514_v51  ;;  %v1592_v51 = vld [vmem:[#allocation5 + $0x30] sm:$0xff]  }
 0x100   :  { %v495_v17 = vclz %v1328_v3  ;;  %v201_v40 = vsel %vm194_vm4, %v197_v7, %v200_v58  ;;  %1624 = vsinq.f32 %v412_v33  ;;  %v417_v54 = vand.u32 3, %v413_v55  ;;  %v1591_v55 = vld [vmem:[#allocation5 + $0x78] sm:$0xff]  }
 0x101   :  { %v202_v22 = vsel %vm192_vm8, nan, %v201_v40  ;;  %v520_v2 = vand.u32 3, %v516_v32  ;;  %v1595_v32 = vld [vmem:[#allocation5 + $0x68] sm:$0xff]  }
 0x102   :  { %v1329_v19 = vadd.s32 4294967294, %v495_v17  ;;  %vm419_vm15 = vcmp.eq.s32.totalorder %v417_v54, 0  ;;  %vm422_vm1 = vcmp.eq.s32.totalorder %v417_v54, 2  ;;  %vm418_vm2 = vcmp.lt.s32.totalorder %v417_v54, 2  ;;  %v1594_v54 = vld [vmem:[#allocation5 + $0x28] sm:$0xff]  }
 0x103   :  { %v1619_v27 = vpop.eup %1618  ;;  %vm525_vm3 = vcmp.eq.s32.totalorder %v520_v2, 2  ;;  %vm522_vm4 = vcmp.eq.s32.totalorder %v520_v2, 0 }
 0x104   :  { %v1621_v20 = vpop.eup %1620  ;;  %v302_v11 = vxor.u32 2147483648, %v1619_v27  ;;  %vm1330_vm10 = vcmp.lt.s32.totalorder %v1329_v19, 0 }
 0x105   :  { %v299_v60 = vxor.u32 2147483648, %v1621_v20  ;;  %v498_v50 = vsel %vm1330_vm10, 0, %v1329_v19 }
 0x106   :  { %v303_v13 = vsel %vm301_vm5, %v302_v11, %v1621_v20  ;;  %v499_v52 = vsub.s32 32, %v498_v50  ;;  %v503_v53 = vsub.s32 4294967266, %v498_v50  ;;  %v500_v47 = vshll.u32 %v491_v4, %v498_v50  ;;  %v1350_v50 = vld [vmem:[%s2336_s3 + $0x5] ss:$0 sm:$0xff] }
 0x107   :  { %v300_v41 = vsel %vm298_vm6, %v1619_v27, %v299_v60  ;;  %vm521_vm5 = vcmp.lt.s32.totalorder %v520_v2, 2  ;;  %vm416_vm6 = vweird.f32 %v1848_v28  ;;  %v1331_v60 = vld [vmem:[%s2336_s3] ss:$0 sm:$0xff]  ;;  %v1340_v28 = vld [vmem:[%s2336_s3 + $0x1] ss:$0 sm:$0xff]  ;;  %v1598_v2 = vld [vmem:[#allocation5 + $0x18] sm:$0xff]  }
 0x108   :  { %v304_v45 = vsel %vm297_vm7, %v300_v41, %v303_v13  ;;  %v501_v39 = vshrl.u32 %v483_v34, %v499_v52  ;;  %v504_v14 = vadd.s32 127, %v503_v53  ;;  %vm519_vm7 = vweird.f32 %v1860_v38 }
 0x109   :  { %v305_v21 = vsel %vm295_vm9, nan, %v304_v45  ;;  %v569_v12 = vmul.f32 %v1331_v60, %v1844_v25  ;;  %v570_v13 = vmul.f32 %v1331_v60, %v1854_v31  ;;  %v1341_v25 = vld [vmem:[%s2336_s3 + $0x4] ss:$0 sm:$0xff] }
 0x10a   :  { %v306_v48 = vpack.c.bf16 %v305_v21, %v202_v22  ;;  %v502_v9 = vor.u32 %v501_v39, %v500_v47  ;;  %v505_v8 = vshll.u32 %v504_v14, 23  ;;  %v672_v42 = vmul.f32 %v1341_v25, %v1842_v24 }
 0x10b   :  { %v673_v52 = vmul.f32 %v1341_v25, %v1852_v30 }
 0x10c   :  { %1449 = vmatmul.mubr.bf16.vlgmr.msra.gmra.mxu0 %v306_v48  ;;  %v506_v15 = vor.u32 4788187, %v505_v8  ;;  %v509_v23 = vcvt.s32.f32 %v502_v9  ;;  %v1623_v61 = vpop.eup %1622 }
 0x10d   :  { %1488 = vmatprep.mubr.msk.bf16.mxu0 %vm1738_vm0, %v1737_v6  ;;  %v1625_v5 = vpop.eup %1624  ;;  %v423_v37 = vxor.u32 2147483648, %v1623_v61  ;;  %1473 = vmatpush3.bf16.msra.mxu0 %v1591_v55 }
 0x10e   :  { %v507_v10 = vand.u32 2147483647, %v506_v15  ;;  %v420_v0 = vxor.u32 2147483648, %v1625_v5  ;;  %1474 = vmatprep.subr.bf16.mxu0 %v1737_v6 }
 0x10f   :  { %v424_v46 = vsel %vm422_vm1, %v423_v37, %v1625_v5  ;;  %v1593_v5 = vld [vmem:[#allocation5 + $0x70] sm:$0xff]   ;;  %v1597_v37 = vld [vmem:[#allocation5 + $0x60] sm:$0xff]  }
 0x110   :  { %v510_v59 = vmul.f32 %v509_v23, %v507_v10  ;;  %v421_v43 = vsel %vm419_vm15, %v1623_v61, %v420_v0  ;;  %v1590_v23 = vld [vmem:[#allocation5 + $0x38] sm:$0xff]   ;;  %v1596_v0 = vld [vmem:[#allocation5 + $0x20] sm:$0xff]  }
 0x111   :  { %v425_v7 = vsel %vm418_vm2, %v421_v43, %v424_v46  ;;  %1475 = vmatpush3.bf16.msra.mxu0 %v1593_v5  ;;  %v1600_v43 = vld [vmem:[#allocation5 + $0x10] sm:$0xff]  }
 0x112   :  { %v511_v26 = vxor.u32 2147483648, %v510_v59  ;;  %v426_v3 = vsel %vm416_vm6, nan, %v425_v7  ;;  %1476 = vmatprep.subr.bf16.mxu0 %v1737_v6  ;;  %v1601_v46 = vld [vmem:[#allocation5 + $0x50] sm:$0xff]   ;;  %v1605_v7 = vld [vmem:[#allocation5 + $0x40] sm:$0xff]  }
 0x114   :  { %v512_v56 = vsel %vm429_vm13, %v511_v26, %v510_v59 }
 0x115   :  { %v515_v36 = vsel %vm428_vm14, %v1860_v38, %v512_v56  ;;  %1477 = vmatpush3.bf16.msra.mxu0 %v1595_v32 }
 0x116   :  { %1626 = vcosq.f32 %v515_v36  ;;  %1478 = vmatprep.subr.bf16.mxu0 %v1737_v6 }
 0x117   :  { %1628 = vsinq.f32 %v515_v36 }
 0x119   :  { %1479 = vmatpush3.bf16.msra.mxu0 %v1597_v37 }
 0x11a   :  { %1480 = vmatprep.subr.bf16.mxu0 %v1737_v6 }
 0x123   :  { %v1627_v4 = vpop.eup %1626 }
 0x124   :  { %v1629_v18 = vpop.eup %1628  ;;  %v526_v27 = vxor.u32 2147483648, %v1627_v4 }
 0x125   :  { %v523_v62 = vxor.u32 2147483648, %v1629_v18 }
 0x126   :  { %v527_v58 = vsel %vm525_vm3, %v526_v27, %v1629_v18  ;;  %v1602_v18 = vld [vmem:[#allocation5 + $0x8] sm:$0xff]  }
 0x127   :  { %v524_v57 = vsel %vm522_vm4, %v1627_v4, %v523_v62  ;;  %v1599_v4 = vld [vmem:[#allocation5 + $0x58] sm:$0xff]   ;;  %v1603_v27 = vld [vmem:[#allocation5 + $0x48] sm:$0xff]   ;;  %v1604_v62 = vld [vmem:[#allocation5] sm:$0xff]  }
 0x128   :  { %v528_v44 = vsel %vm521_vm5, %v524_v57, %v527_v58  ;;  %1481 = vmatpush3.bf16.msra.mxu0 %v1599_v4 }
 0x129   :  { %v529_v20 = vsel %vm519_vm7, nan, %v528_v44  ;;  %1482 = vmatprep.subr.bf16.mxu0 %v1737_v6 }
 0x12a   :  { %v530_v11 = vpack.c.bf16 %v529_v20, %v426_v3 }
 0x12c   :  { %1469 = vmatmul.mubr.bf16.vlgmr.msra.gmra.mxu1 %v530_v11  ;;  %1483 = vmatpush3.bf16.msra.mxu0 %v1601_v46 }
 0x12d   :  { %1508 = vmatprep.mubr.msk.bf16.mxu1 %vm1738_vm0, %v1737_v6  ;;  %1493 = vmatpush3.bf16.msra.mxu1 %v1590_v23 }
 0x12e   :  { %1494 = vmatprep.subr.bf16.mxu1 %v1737_v6  ;;  %1484 = vmatprep.subr.bf16.mxu0 %v1737_v6 }
 0x130   :  { %1485 = vmatpush3.bf16.msra.mxu0 %v1603_v27  ;;  %v1606_v27 = vld [vmem:[#allocation7 + $0x38] sm:$0xff]  }
 0x131   :  { %1495 = vmatpush3.bf16.msra.mxu1 %v1592_v51  ;;  %1486 = vmatprep.subr.bf16.mxu0 %v1737_v6 }
 0x132   :  { %1496 = vmatprep.subr.bf16.mxu1 %v1737_v6 }
 0x134   :  { %1487 = vmatpush3.bf16.msra.mxu0 %v1605_v7  ;;  %v1608_v7 = vld [vmem:[#allocation7 + $0x28] sm:$0xff]  }
 0x135   :  { %1497 = vmatpush3.bf16.msra.mxu1 %v1594_v54  ;;  %1512 = vmatprep.subr.bf16.mxu0 %v1737_v6 }
 0x136   :  { %1498 = vmatprep.subr.bf16.mxu1 %v1737_v6 }
 0x139   :  { %1499 = vmatpush3.bf16.msra.mxu1 %v1596_v0 }
 0x13a   :  { %1500 = vmatprep.subr.bf16.mxu1 %v1737_v6 }
 0x13d   :  { %1501 = vmatpush3.bf16.msra.mxu1 %v1598_v2 }
 0x13e   :  { %1502 = vmatprep.subr.bf16.mxu1 %v1737_v6 }
 0x141   :  { %1503 = vmatpush3.bf16.msra.mxu1 %v1600_v43 }
 0x142   :  { %1504 = vmatprep.subr.bf16.mxu1 %v1737_v6 }
 0x145   :  { %1505 = vmatpush3.bf16.msra.mxu1 %v1602_v18 }
 0x146   :  { %1506 = vmatprep.subr.bf16.mxu1 %v1737_v6 }
 0x149   :  { %1507 = vmatpush3.bf16.msra.mxu1 %v1604_v62  ;;  %v1607_v62 = vld [vmem:[#allocation7 + $0x30] sm:$0xff]  }
 0x1cc   :  { %v653_v17 = vpop.f32.mrf.mxu0 }
 0x1cd   :  { %v654_v38 = vadd.f32 %v653_v17, %v569_v12  ;;  %v1351_v12 = vld [vmem:[%s2336_s3 + $0x2] ss:$0 sm:$0xff] }
 0x1ce   :  { %v1450_v40 = vpop.f32.mrf.mxu0 }
 0x1cf   :  { %v665_v41 = vadd.f32 %v1340_v28, %v654_v38  ;;  %v1352_v40 = vld [vmem:[%s2336_s3 + $0x3] ss:$0 sm:$0xff] }
 0x1d0   :  { %v656_v19 = vpop.f32.mrf.mxu0 }
 0x1d1   :  { %v657_v45 = vadd.f32 %v656_v19, %v570_v13  ;;  %772 = vadd.xlane.f32.xlu0 %v665_v41 }
 0x1d2   :  { %v1451_v22 = vpop.f32.mrf.mxu0 }
 0x1d3   :  { %v666_v21 = vadd.f32 %v1340_v28, %v657_v45 }
 0x1d5   :  { %774 = vadd.xlane.f32.xlu1 %v666_v21 }
 0x1ec   :  { %v756_v48 = vpop.f32.mrf.mxu1 }
 0x1ed   :  { %v757_v34 = vadd.f32 %v756_v48, %v672_v42 }
 0x1ee   :  { %v1470_v31 = vpop.f32.mrf.mxu1 }
 0x1ef   :  { %v768_v53 = vadd.f32 %v1350_v50, %v757_v34 }
 0x1f0   :  { %v759_v29 = vpop.f32.mrf.mxu1 }
 0x1f1   :  { %v760_v47 = vadd.f32 %v759_v29, %v673_v52  ;;  %811 = vadd.xlane.f32.xlu0 %v768_v53  ;;  %v1353_v29 = vld [vmem:[%s2336_s3 + $0x6] ss:$0 sm:$0xff] }
 0x1f2   :  { %v1471_v39 = vpop.f32.mrf.mxu1 }
 0x1f3   :  { %v769_v14 = vadd.f32 %v1350_v50, %v760_v47 }
 0x1f5   :  { %813 = vadd.xlane.f32.xlu0 %v769_v14 }
 0x25a   :  { %v773_v49 = vpop.xlane.xlu0 %772 }
 0x25b   :  { %v777_v9 = vmul.f32 0.0078125, %v773_v49  ;;  %v1354_v49 = vld [vmem:[%s2336_s3 + $0x7] ss:$0 sm:$0xff] }
 0x25d   :  { %v2226_v8 = vsub.f32 %v665_v41, %v777_v9 }
 0x25e   :  { %v775_v24 = vpop.xlane.xlu1 %774 }
 0x25f   :  { %v778_v33 = vmul.f32 0.0078125, %v775_v24  ;;  %v781_v15 = vmul.f32 %v2226_v8, %v2226_v8 }
 0x261   :  { %v2230_v10 = vsub.f32 %v666_v21, %v778_v33  ;;  %783 = vadd.xlane.f32.xlu1 %v781_v15 }
 0x263   :  { %v782_v30 = vmul.f32 %v2230_v10, %v2230_v10 }
 0x265   :  { %785 = vadd.xlane.f32.xlu0 %v782_v30 }
 0x27a   :  { %v812_v59 = vpop.xlane.xlu0 %811 }
 0x27b   :  { %v815_v26 = vmul.f32 0.0078125, %v812_v59 }
 0x27d   :  { %v2235_v63 = vsub.f32 %v768_v53, %v815_v26 }
 0x27e   :  { %v814_v56 = vpop.xlane.xlu0 %813 }
 0x27f   :  { %v816_v36 = vmul.f32 0.0078125, %v814_v56  ;;  %v819_v35 = vmul.f32 %v2235_v63, %v2235_v63 }
 0x281   :  { %v2239_v16 = vsub.f32 %v769_v14, %v816_v36  ;;  %821 = vadd.xlane.f32.xlu1 %v819_v35  ;;  %v1371_v36 = vld [vmem:[%s2338_s5] ss:$0 sm:$0xff] }
 0x283   :  { %v820_v61 = vmul.f32 %v2239_v16, %v2239_v16 }
 0x285   :  { %823 = vadd.xlane.f32.xlu0 %v820_v61 }
 0x2ea   :  { %v784_v58 = vpop.xlane.xlu1 %783 }
 0x2eb   :  { %v787_v57 = vmul.f32 0.0078125, %v784_v58  ;;  %v1609_v58 = vld [vmem:[#allocation7 + $0x20] sm:$0xff]  }
 0x2ed   :  { %v789_v44 = vadd.f32 1e-05, %v787_v57  ;;  %v1610_v57 = vld [vmem:[#allocation7 + $0x18] sm:$0xff]  }
 0x2ee   :  { %v786_v3 = vpop.xlane.xlu0 %785 }
 0x2ef   :  { %1630 = vrsqrt.f32 %v789_v44  ;;  %v788_v20 = vmul.f32 0.0078125, %v786_v3  ;;  %v1611_v44 = vld [vmem:[#allocation7 + $0x10] sm:$0xff]   ;;  %v1612_v3 = vld [vmem:[#allocation7 + $0x8] sm:$0xff]  }
 0x2f1   :  { %v790_v11 = vadd.f32 1e-05, %v788_v20  ;;  %v1613_v20 = vld [vmem:[#allocation7] sm:$0xff]  }
 0x2f3   :  { %1632 = vrsqrt.f32 %v790_v11  ;;  %v1642_v11 = vld [vmem:[%s2333_s0] sm:$0xff] }
 0x2f4   :  { %vm1240_vm8 = vcmp.eq.f32.partialorder %v1642_v11, 2.0  ;;  %vm1259_vm11 = vcmp.eq.f32.partialorder %v1642_v11, 3.0  ;;  %vm74_vm13 = vcmp.ne.f32.partialorder %v1642_v11, 0.0 }
 0x2fc   :  { %v1631_v60 = vpop.eup %1630 }
 0x2fd   :  { %v793_v17 = vmul.f32 %v1631_v60, %v2226_v8  ;;  %v1745_v60 = vmov 2  }
 0x2fe   :  { %1570 = vset.pattern.permute.xlu1 %v1745_v60  ;;  %1571 = vset.pattern.permute.xlu0 %v1745_v60 }
 0x2ff   :  { %v799_v28 = vmul.f32 %v1351_v12, %v793_v17  ;;  %v1643_v17 = vld [vmem:[%s2333_s0 + $0x8] sm:$0xff] }
 0x300   :  { %v1633_v38 = vpop.eup %1632  ;;  %vm1217_vm9 = vcmp.eq.f32.partialorder %v1643_v17, 0.0  ;;  %vm1241_vm10 = vcmp.eq.f32.partialorder %v1643_v17, 2.0  ;;  %vm1260_vm12 = vcmp.eq.f32.partialorder %v1643_v17, 3.0  ;;  %vm75_vm14 = vcmp.ne.f32.partialorder %v1643_v17, 0.0 }
 0x301   :  { %v794_v13 = vmul.f32 %v1633_v38, %v2230_v10  ;;  %v805_v19 = vadd.f32 %v1352_v40, %v799_v28  ;;  %v1221_v28 = vsel %vm1217_vm9, 1, %v1736_v1  ;;  %v1244_v38 = vsel %vm1241_vm10, 1, %v1736_v1 }
 0x303   :  { %v800_v41 = vmul.f32 %v1351_v12, %v794_v13  ;;  %v807_v22 = vmax.f32 %v805_v19, 0.0  ;;  %v1262_v13 = vsel %vm1259_vm11, 1, %v1736_v1  ;;  %v1280_v19 = vsel %vm74_vm13, 1, %v1736_v1 }
 0x305   :  { %v806_v45 = vadd.f32 %v1352_v40, %v800_v41  ;;  %v1746_v40 = vmov 3   ;;  %v1263_v41 = vsel %vm1260_vm12, 1, %v1736_v1 }
 0x307   :  { %v808_v21 = vmax.f32 %v806_v45, 0.0  ;;  %v1281_v45 = vsel %vm75_vm14, 1, %v1736_v1 }
 0x309   :  { %v847_v25 = vpack.c.bf16 %v808_v21, %v807_v22 }
 0x30a   :  { %v822_v42 = vpop.xlane.xlu1 %821 }
 0x30b   :  { %1509 = vmatmul.mubr.bf16.vlgmr.msra.gmra.mxu1 %v847_v25  ;;  %v825_v48 = vmul.f32 0.0078125, %v822_v42 }
 0x30d   :  { %v827_v50 = vadd.f32 1e-05, %v825_v48 }
 0x30e   :  { %v824_v34 = vpop.xlane.xlu0 %823 }
 0x30f   :  { %1634 = vrsqrt.f32 %v827_v50  ;;  %v826_v31 = vmul.f32 0.0078125, %v824_v34 }
 0x311   :  { %v828_v52 = vadd.f32 1e-05, %v826_v31  ;;  %v1372_v31 = vld [vmem:[%s2338_s5 + $0x1] ss:$0 sm:$0xff] }
 0x313   :  { %1636 = vrsqrt.f32 %v828_v52 }
 0x31c   :  { %v1635_v53 = vpop.eup %1634 }
 0x31d   :  { %v831_v47 = vmul.f32 %v1635_v53, %v2235_v63 }
 0x31f   :  { %v837_v39 = vmul.f32 %v1353_v29, %v831_v47 }
 0x320   :  { %v1637_v14 = vpop.eup %1636 }
 0x321   :  { %v832_v9 = vmul.f32 %v1637_v14, %v2239_v16  ;;  %v843_v24 = vadd.f32 %v1354_v49, %v837_v39 }
 0x323   :  { %v838_v8 = vmul.f32 %v1353_v29, %v832_v9  ;;  %v845_v15 = vmax.f32 %v843_v24, 0.0 }
 0x325   :  { %v844_v33 = vadd.f32 %v1354_v49, %v838_v8 }
 0x327   :  { %v846_v10 = vmax.f32 %v844_v33, 0.0 }
 0x329   :  { %v864_v30 = vpack.c.bf16 %v846_v10, %v845_v15 }
 0x32b   :  { %1489 = vmatmul.mubr.bf16.vlgmr.msra.gmra.mxu0 %v864_v30 }
 0x32c   :  { %1528 = vmatprep.mubr.msk.bf16.mxu0 %vm1738_vm0, %v1737_v6  ;;  %1513 = vmatpush3.bf16.msra.mxu0 %v1606_v27  ;;  %vm1216_vm0 = vcmp.eq.f32.partialorder %v1642_v11, 0.0 }
 0x32d   :  { %1514 = vmatprep.subr.bf16.mxu0 %v1737_v6  ;;  %v1220_v12 = vsel %vm1216_vm0, 1, %v1736_v1 }
 0x330   :  { %1515 = vmatpush3.bf16.msra.mxu0 %v1607_v62 }
 0x331   :  { %1516 = vmatprep.subr.bf16.mxu0 %v1737_v6 }
 0x334   :  { %1517 = vmatpush3.bf16.msra.mxu0 %v1608_v7 }
 0x335   :  { %1518 = vmatprep.subr.bf16.mxu0 %v1737_v6 }
 0x338   :  { %1519 = vmatpush3.bf16.msra.mxu0 %v1609_v58 }
 0x339   :  { %1520 = vmatprep.subr.bf16.mxu0 %v1737_v6 }
 0x33c   :  { %1521 = vmatpush3.bf16.msra.mxu0 %v1610_v57 }
 0x33d   :  { %1522 = vmatprep.subr.bf16.mxu0 %v1737_v6 }
 0x340   :  { %1523 = vmatpush3.bf16.msra.mxu0 %v1611_v44 }
 0x341   :  { %1524 = vmatprep.subr.bf16.mxu0 %v1737_v6 }
 0x344   :  { %1525 = vmatpush3.bf16.msra.mxu0 %v1612_v3 }
 0x345   :  { %1526 = vmatprep.subr.bf16.mxu0 %v1737_v6  ;;  %v1243_v6 = vsel %vm1240_vm8, 1, %v1736_v1  ;;  %v1373_v1 = vld [vmem:[%s2338_s5 + $0x2] ss:$0 sm:$0xff] }
 0x348   :  { %1527 = vmatpush3.bf16.msra.mxu0 %v1613_v20 }
 0x3cb   :  { %v1053_v23 = vpop.f32.mrf.mxu1 }
 0x3cd   :  { %v1510_v59 = vpop.f32.mrf.mxu1 }
 0x3ce   :  { %v1384_v59 = vld [vmem:[%s2340_s7 + $0x1] ss:$0 sm:$0xff] }
 0x3cf   :  { %v1056_v26 = vpop.f32.mrf.mxu1 }
 0x3d1   :  { %v1511_v63 = vpop.f32.mrf.mxu1 }
 0x3eb   :  { %v964_v56 = vpop.f32.mrf.mxu0 }
 0x3ec   :  { %v1054_v35 = vadd.f32 %v1053_v23, %v964_v56  ;;  %v1383_v23 = vld [vmem:[%s2340_s7] ss:$0 sm:$0xff] }
 0x3ed   :  { %v1490_v16 = vpop.f32.mrf.mxu0 }
 0x3ee   :  { %v1065_v61 = vadd.f32 %v1371_v36, %v1054_v35  ;;  %v1374_v35 = vld [vmem:[%s2338_s5 + $0x3] ss:$0 sm:$0xff]  ;;  %s1747_s5 = smov [#allocation8]  }
 0x3ef   :  { %v967_v55 = vpop.f32.mrf.mxu0  ;;  %s1299_s14 = sshll.u32 %s1747_s5, 4  ;;  %s1300_s14 = int_to_ptr.vmem [resolvable:$true] %s1299_s14 }
 0x3f0   :  { %v1057_v51 = vadd.f32 %v1056_v26, %v967_v55  ;;  %1069 = vadd.xlane.f32.xlu1 %v1065_v61  ;;  %p1709_p2 = scmp.lt.s32.totalorder %s1300_s14, %s1300_s14 }
 0x3f1   :  { %v1491_v5 = vpop.f32.mrf.mxu0 }
 0x3f2   :  { %v1066_v54 = vadd.f32 %v1371_v36, %v1057_v51  ;;  %v1385_v36 = vld [vmem:[%s2340_s7 + $0x2] ss:$0 sm:$0xff] }
 0x3f4   :  { %1071 = vadd.xlane.f32.xlu0 %v1066_v54 }
 0x479   :  { %v1070_v32 = vpop.xlane.xlu1 %1069 }
 0x47a   :  { %v1073_v0 = vmul.f32 0.0078125, %v1070_v32 }
 0x47c   :  { %v2278_v37 = vsub.f32 %v1065_v61, %v1073_v0  ;;  %v1386_v61 = vld [vmem:[%s2340_s7 + $0x3] ss:$0 sm:$0xff]  ;;  %s1704_s7 = scalar_lea.vmem %s1300_s14, 256 }
 0x47d   :  { %v1072_v2 = vpop.xlane.xlu0 %1071  ;;  %p1705_p1 = scmp.ne.s32.totalorder %s1300_s14, %s1704_s7  ;;  %p1710_p3 = scmp.lt.s32.totalorder %s1704_s7, %s1704_s7 }
 0x47e   :  { %v1074_v4 = vmul.f32 0.0078125, %v1072_v2  ;;  %v1077_v43 = vmul.f32 %v2278_v37, %v2278_v37 }
 0x47f   :  { %p1711_p4 = por %p1710_p3, %p1709_p2 }
 0x480   :  { %v2282_v46 = vsub.f32 %v1066_v54, %v1074_v4  ;;  %1079 = vadd.xlane.f32.xlu1 %v1077_v43 }
 0x481   :  { %p1712_p5 = pnand %p1711_p4, %p1705_p1 }
 0x482   :  { %v1078_v18 = vmul.f32 %v2282_v46, %v2282_v46 }
 0x484   :  { %1081 = vadd.xlane.f32.xlu0 %v1078_v18 }
 0x491   :  { %1223 = vperm.xlu1 %1570, %v1220_v12  }
 0x495   :  { %1246 = vperm.xlu1 %1570, %v1243_v6  }
 0x499   :  { %1249 = vperm.xlu1 %1570, %v1244_v38  }
 0x49a   :  { %1226 = vperm.xlu0 %1571, %v1221_v28  }
 0x49d   :  { %1265 = vperm.xlu1 %1570, %v1262_v13  }
 0x49e   :  { %1573 = vset.pattern.permute.xlu0 %v1746_v40 }
 0x4a1   :  { %1268 = vperm.xlu1 %1570, %v1263_v41  }
 0x4a5   :  { %1572 = vset.pattern.permute.xlu1 %v1746_v40 }
 0x4a6   :  { %1283 = vperm.xlu1 %1572, %v1280_v19  }
 0x4aa   :  { %1286 = vperm.xlu1 %1572, %v1281_v45  }
 0x509   :  { %v1080_v22 = vpop.xlane.xlu1 %1079 }
 0x50a   :  { %v1083_v21 = vmul.f32 0.0078125, %v1080_v22 }
 0x50c   :  { %v1085_v25 = vadd.f32 1e-05, %v1083_v21 }
 0x50d   :  { %v1082_v42 = vpop.xlane.xlu0 %1081  ;;  %v1224_v33 = vpop.permute.xlu1 %1223 }
 0x50e   :  { %1638 = vrsqrt.f32 %v1085_v25  ;;  %v1084_v48 = vmul.f32 0.0078125, %v1082_v42  ;;  %vm1228_vm15 = vcmp.eq.s32.totalorder %v1224_v33, 1 }
 0x50f   :  { %v1238_v56 = vsel %vm1228_vm15, %v1383_v23, %v1384_v59 }
 0x510   :  { %v1086_v50 = vadd.f32 1e-05, %v1084_v48 }
 0x511   :  { %v1247_v15 = vpop.permute.xlu1 %1246 }
 0x512   :  { %1640 = vrsqrt.f32 %v1086_v50  ;;  %vm1251_vm1 = vcmp.eq.s32.totalorder %v1247_v15, 1 }
 0x513   :  { %v1257_v16 = vsel %vm1251_vm1, %v1385_v36, %v1238_v56 }
 0x515   :  { %v1250_v10 = vpop.permute.xlu1 %1249  ;;  %v1227_v26 = vpop.permute.xlu0 %1226 }
 0x516   :  { %vm1229_vm2 = vcmp.eq.s32.totalorder %v1227_v26, 1  ;;  %vm1252_vm4 = vcmp.eq.s32.totalorder %v1250_v10, 1 }
 0x517   :  { %v1239_v51 = vsel %vm1229_vm2, %v1383_v23, %v1384_v59 }
 0x519   :  { %v1266_v30 = vpop.permute.xlu1 %1265 }
 0x51a   :  { %vm1270_vm3 = vcmp.eq.s32.totalorder %v1266_v30, 1 }
 0x51b   :  { %v1639_v34 = vpop.eup %1638  ;;  %v1276_v32 = vsel %vm1270_vm3, %v1386_v61, %v1257_v16 }
 0x51c   :  { %v1089_v52 = vmul.f32 %v1639_v34, %v2278_v37  ;;  %v1258_v37 = vsel %vm1252_vm4, %v1385_v36, %v1239_v51 }
 0x51d   :  { %v1269_v63 = vpop.permute.xlu1 %1268 }
 0x51e   :  { %v1095_v53 = vmul.f32 %v1372_v31, %v1089_v52  ;;  %vm1271_vm6 = vcmp.eq.s32.totalorder %v1269_v63, 1 }
 0x51f   :  { %v1641_v29 = vpop.eup %1640  ;;  %v1277_v27 = vsel %vm1271_vm6, %v1386_v61, %v1258_v37 }
 0x520   :  { %v1090_v47 = vmul.f32 %v1641_v29, %v2282_v46  ;;  %v1101_v14 = vadd.f32 %v1373_v1, %v1095_v53 }
 0x521   :  { %v1284_v55 = vpop.permute.xlu1 %1283 }
 0x522   :  { %v1096_v39 = vmul.f32 %v1372_v31, %v1090_v47  ;;  %v1103_v9 = vmax.f32 %v1101_v14, 0.0  ;;  %vm1288_vm5 = vcmp.eq.s32.totalorder %v1284_v55, 1 }
 0x524   :  { %v1102_v49 = vadd.f32 %v1373_v1, %v1096_v39 }
 0x525   :  { %v1287_v46 = vpop.permute.xlu1 %1286 }
 0x526   :  { %v1104_v8 = vmax.f32 %v1102_v49, 0.0  ;;  %vm1289_vm7 = vcmp.eq.s32.totalorder %v1287_v46, 1 }
 0x528   :  { %v1105_v24 = vpack.c.bf16 %v1104_v8, %v1103_v9 }
 0x52a   :  { %1529 = vmatmul.mubr.bf16.vlgmr.msra.gmra.mxu0 %v1105_v24 }
 0x5ea   :  { %v1209_v5 = vpop.f32.mrf.mxu0 }
 0x5eb   :  { %v1210_v54 = vadd.f32 %v1374_v35, %v1209_v5 }
 0x5ec   :  { %v1530_v0 = vpop.f32.mrf.mxu0 }
 0x5ed   :  { %v1278_v2 = vadd.f32 %v1276_v32, %v1210_v54 }
 0x5ee   :  { %v1212_v4 = vpop.f32.mrf.mxu0 }
 0x5ef   :  { %v1290_v43 = vsel %vm1288_vm5, %v1278_v2, 0.0  ;;  %v1213_v18 = vadd.f32 %v1374_v35, %v1212_v4 }
 0x5f0   :  { %1292 = vst [vmem:[#allocation8] sm:$0xff] %v1290_v43  ;;  %v1531_v62 = vpop.f32.mrf.mxu0 }
 0x5f1   :  { %v1279_v7 = vadd.f32 %v1277_v27, %v1213_v18 }
 0x5f3   :  { %v1291_v58 = vsel %vm1289_vm7, %v1279_v7, 0.0 }
 0x5f4   :  { %1293 = vst [vmem:[#allocation8 + $0x8] sm:$0xff] %v1291_v58 }
 0x5f5   :  { %1715 = shalt.err (!%p1712_p5)
}
 0x5f6   :  { %s1748_s15 = smov 128   ;;  %s1749_s16 = smov 8  }
 0x5f7   :  { %1305 = dma.vmem_to_hbm [thread:$0]  %s1300_s14, 256, %s2341_s8, [#allocation4], %s1748_s15, %s1748_s15, %s1749_s16  }
 0x5f8   :  { %1728 = dma.done.wait [#allocation4], 256  }
 0x5f9   :  { %1729 = vsyncadd [#allocation4], 4294967040 }
 0x5fa   :  { %1309 = vsyncpa [#allocation3], 1 }
 0x5fb   :  { %1310 = vsyncpa [#allocation6], 1 }
 0x5fc   :  { %1311 = vsyncpa [#allocation4], 1 }

</bundles_post_ra>
